<compile_context>
chip_gen: v6e
topology: v6e:2x2x1
jax: 0.10.0
libtpu: 0.0.40
codegen_flags: <defaults>
</compile_context>

<pallas_src>
import numpy as np
import jax
import jax.numpy as jnp
from jax.experimental import pallas as pl
from jax.experimental.pallas import tpu as pltpu

GN_EPS = 1e-5


def shuffle_attn_kernel(x_ref, mats_ref, bias_ref, o_ref):
    TB, C, HW = x_ref.shape
    inv_hw = 1.0 / HW

    # Constants stay VMEM-resident across the whole grid (constant index_map).
    statw = mats_ref[0:2 * C, :]        # (2C, C)  = [GRP ; WT] stacked
    grp = statw[0:C, :]                 # (C, C)   GN group-averaging matrix
    wbp = mats_ref[2 * C:3 * C, :]      # (C, C)   gamma-folded conv_bottom
    bias = bias_ref[...]                # (C, 1)   fused bias (beta folded in)

    def per_batch(i, carry):
        x = x_ref[i].astype(jnp.float32)                              # (C, HW)

        # Per-channel spatial mean feeds both branches.
        m = jnp.sum(x, axis=1, keepdims=True) * inv_hw                # (C, 1)

        # One dot gives GN group means (rows 0..C) and top-branch logits
        # (rows C..2C): statw rows are zero on the "other" layer's channels.
        mt = jnp.dot(statw, m, preferred_element_type=jnp.float32)    # (2C, 1)
        mu = mt[0:C]
        t = mt[C:2 * C]

        # Two-pass (centered) GroupNorm variance.
        centered = x - mu
        s2 = jnp.sum(centered * centered, axis=1, keepdims=True) * inv_hw
        var = jnp.dot(grp, s2, preferred_element_type=jnp.float32)    # (C, 1)
        rs = jax.lax.rsqrt(var + GN_EPS)                              # finite on
        # top-layer rows (var=0 there) and killed by wbp's zero columns.

        # Fused attention logits: wbp rows vanish on top-layer channels and
        # t rows vanish on bottom-layer channels, so one sigmoid covers both.
        b = jnp.dot(wbp, centered * rs, preferred_element_type=jnp.float32)
        scale = jax.nn.sigmoid(b + t + bias)

        o_ref[i] = (x * scale).astype(o_ref.dtype)
        return carry

    jax.lax.fori_loop(0, TB, per_batch, 0, unroll=TB <= 8)


def _build_constants(params, C, group_num):
    """Block-diagonal fused weights + fused bias (host-side, once)."""
    wt, bt, wb, bb, gamma, beta = (np.asarray(p, np.float32) for p in params)
    group_size = C // group_num
    L = group_size // 2            # layer_size
    ng = L // 2                    # GroupNorm num_groups
    ch_per = L // ng               # channels per GN group

    GRP = np.zeros((C, C), np.float32)
    WT = np.zeros((C, C), np.float32)
    WBP = np.zeros((C, C), np.float32)
    bias = np.zeros((C, 1), np.float32)

    wbp_block = wb * gamma[None, :]          # fold gamma into columns of WB
    bb_fused = bb + wb @ beta                # fold beta into the bias

    for g in range(group_num):
        top = g * group_size                 # layer-0 channels: [top, top+L)
        bot = top + L                        # layer-1 channels: [bot, bot+L)
        WT[top:top + L, top:top + L] = wt
        WBP[bot:bot + L, bot:bot + L] = wbp_block
        bias[top:top + L, 0] = bt
        bias[bot:bot + L, 0] = bb_fused
        for j0 in range(0, L, ch_per):
            GRP[bot + j0:bot + j0 + ch_per,
                bot + j0:bot + j0 + ch_per] = 1.0 / ch_per

    mats = np.concatenate([GRP, WT, WBP], axis=0)     # (3C, C)
    return jnp.asarray(mats), jnp.asarray(bias)


def _choose_tb(B, bytes_per_batch, target_bytes=1 << 20, min_grid=4):
    """Largest batch-tile that divides B, fits the block budget, and (if
    possible) keeps >= min_grid grid steps for pipelining / megacore."""
    divisors = [d for d in range(1, B + 1) if B % d == 0]
    fits = [d for d in divisors if d * bytes_per_batch <= target_bytes] or [1]
    pref = [d for d in fits if B // d >= min_grid]
    return max(pref if pref else fits)


def shuffle_attn_block(x, params, group_num):
    """Pallas implementation of ShuffleAttnBlock.forward (NCHW in/out)."""
    B, C, H, W = x.shape
    HW = H * W
    mats, bias = _build_constants(params, C, group_num)
    x2 = x.reshape(B, C, HW)       # free reshape (merges trailing dims)

    itemsize = jnp.dtype(x.dtype).itemsize
    TB = _choose_tb(B, C * HW * itemsize)
    block_bytes = TB * C * HW * itemsize
    # Double-buffered in + out blocks + constants + f32 intermediates,
    # with headroom; capped at v7x's 64 MiB physical VMEM.
    vmem_limit = int(min(64 * 1024 * 1024,
                         max(16 * 1024 * 1024,
                             4 * block_bytes + 8 * 1024 * 1024)))

    cost = pl.CostEstimate(
        flops=int(B * (2 * C * C * HW + 6 * C * HW)),
        transcendentals=int(B * C * HW + 2 * B * C),
        bytes_accessed=int(2 * B * C * HW * itemsize + (mats.size + bias.size) * 4),
    )

    out = pl.pallas_call(
        shuffle_attn_kernel,
        out_shape=jax.ShapeDtypeStruct((B, C, HW), x.dtype),
        grid=(B // TB,),
        in_specs=[
            pl.BlockSpec((TB, C, HW), lambda b: (b, 0, 0)),   # activations
            pl.BlockSpec((3 * C, C), lambda b: (0, 0)),       # fused weights
            pl.BlockSpec((C, 1), lambda b: (0, 0)),           # fused bias
        ],
        out_specs=pl.BlockSpec((TB, C, HW), lambda b: (b, 0, 0)),
        compiler_params=pltpu.CompilerParams(
            dimension_semantics=("parallel",),
            vmem_limit_bytes=vmem_limit),
        cost_estimate=cost,
    )(x2, mats, bias)
    return out.reshape(B, C, H, W)


def reference(x, params, group_num):
    """Pure-JAX reference mirroring the PyTorch forward exactly."""
    B, C, H, W = x.shape
    group_size = C // group_num
    L = group_size // 2
    ng = L // 2
    wt, bt, wb, bb, gamma, beta = params
    outs = []
    for gi in range(group_num):
        grp = x[:, gi * group_size:(gi + 1) * group_size]
        l0 = grp[:, :L]
        l1 = grp[:, L:]
        m = l0.mean(axis=(2, 3), keepdims=True)                       # (B,L,1,1)
        t = jnp.einsum('oc,bcij->boij', wt, m) + bt[None, :, None, None]
        s_top = jax.nn.sigmoid(t)
        l1r = l1.reshape(B, ng, L // ng, H, W)
        mu = l1r.mean(axis=(2, 3, 4), keepdims=True)
        var = ((l1r - mu) ** 2).mean(axis=(2, 3, 4), keepdims=True)
        l1n = ((l1r - mu) / jnp.sqrt(var + GN_EPS)).reshape(B, L, H, W)
        l1n = l1n * gamma[None, :, None, None] + beta[None, :, None, None]
        bo = jnp.einsum('oc,bchw->bohw', wb, l1n) + bb[None, :, None, None]
        s_bot = jax.nn.sigmoid(bo)
        outs.append(jnp.concatenate([l0 * s_top, l1 * s_bot], axis=1))
    return jnp.concatenate(outs, axis=1)


if __name__ == "__main__":
    # in_channels=32, group_num=4 -> group_size=8, layer_size=4, GN groups=2.
    B, C, H, W = 16, 32, 16, 16
    group_num = 4
    group_size = C // group_num
    L = group_size // 2

    key = jax.random.PRNGKey(0)
    ks = jax.random.split(key, 7)
    x = jax.random.normal(ks[0], (B, C, H, W), jnp.float32)

    # Synthetic parameters (1x1 conv weights as (L, L) matrices).
    wt = jax.random.normal(ks[1], (L, L), jnp.float32) * 0.3
    bt = jax.random.normal(ks[2], (L,), jnp.float32) * 0.1
    wb = jax.random.normal(ks[3], (L, L), jnp.float32) * 0.3
    bb = jax.random.normal(ks[4], (L,), jnp.float32) * 0.1
    gamma = 1.0 + 0.1 * jax.random.normal(ks[5], (L,), jnp.float32)
    beta = 0.1 * jax.random.normal(ks[6], (L,), jnp.float32)
    params = (wt, bt, wb, bb, gamma, beta)

    out = shuffle_attn_block(x, params, group_num)
    out = jax.block_until_ready(out)

    ref = reference(x, params, group_num)
    assert out.shape == x.shape
    np.testing.assert_allclose(np.asarray(out), np.asarray(ref),
                               rtol=1e-4, atol=1e-4)
    print("KERNEL_OK")
</pallas_src>

<mosaic_0001>
module attributes {stable_mosaic.version = 11 : i64} {
  func.func @shuffle_attn_kernel(%arg0: i32, %arg1: memref<4x32x256xf32, #tpu.memory_space<vmem>>, %arg2: memref<96x32xf32, #tpu.memory_space<vmem>>, %arg3: memref<32x1xf32, #tpu.memory_space<vmem>>, %arg4: memref<4x32x256xf32, #tpu.memory_space<vmem>>) attributes {dimension_semantics = [#tpu.dimension_semantics<parallel>], iteration_bounds = array<i64: 4>, scalar_prefetch = 0 : i64, scratch_operands = 0 : i64, tpu.core_type = #tpu.core_type<tc>, window_params = [{transform_indices = @transform_0, window_bounds = array<i64: 4, 32, 256>}, {pipeline_mode = #tpu.pipeline_mode<synchronous>, transform_indices = @transform_1, window_bounds = array<i64: 96, 32>}, {pipeline_mode = #tpu.pipeline_mode<synchronous>, transform_indices = @transform_2, window_bounds = array<i64: 32, 1>}, {transform_indices = @transform_3, window_bounds = array<i64: 4, 32, 256>}]} {
    %c0 = arith.constant 0 : index
    %c0_0 = arith.constant 0 : index
    %0 = vector.load %arg2[%c0, %c0_0] : memref<96x32xf32, #tpu.memory_space<vmem>>, vector<64x32xf32>
    %1 = vector.extract_strided_slice %0 {offsets = [0, 0], sizes = [32, 32], strides = [1, 1]} : vector<64x32xf32> to vector<32x32xf32>
    %c64 = arith.constant 64 : index
    %c0_1 = arith.constant 0 : index
    %2 = vector.load %arg2[%c64, %c0_1] : memref<96x32xf32, #tpu.memory_space<vmem>>, vector<32x32xf32>
    %c0_2 = arith.constant 0 : index
    %c0_3 = arith.constant 0 : index
    %3 = vector.load %arg3[%c0_2, %c0_3] : memref<32x1xf32, #tpu.memory_space<vmem>>, vector<32x1xf32>
    %c0_i32 = arith.constant 0 : i32
    %4 = arith.index_cast %c0_i32 : i32 to index
    %c0_4 = arith.constant 0 : index
    %c0_5 = arith.constant 0 : index
    %5 = vector.load %arg1[%4, %c0_4, %c0_5] : memref<4x32x256xf32, #tpu.memory_space<vmem>>, vector<1x32x256xf32>
    %6 = vector.shape_cast %5 : vector<1x32x256xf32> to vector<32x256xf32>
    %cst = arith.constant dense<0.000000e+00> : vector<32xf32>
    %7 = vector.multi_reduction <add>, %6, %cst [1] : vector<32x256xf32> to vector<32xf32>
    %8 = vector.shape_cast %7 : vector<32xf32> to vector<32x1xf32>
    %cst_6 = arith.constant 3.906250e-03 : f32
    %9 = vector.broadcast %cst_6 : f32 to vector<32x1xf32>
    %10 = arith.mulf %8, %9 : vector<32x1xf32>
    %cst_7 = arith.constant dense<0.000000e+00> : vector<64x1xf32>
    %11 = tpu.matmul %0, %10, %cst_7 {dimension_numbers = #tpu.dot_dimension_numbers<[1], [0], [0], [1], [0, 0, 1, 1], [], []>} : vector<64x32xf32>, vector<32x1xf32>, vector<64x1xf32> -> vector<64x1xf32>
    %12 = vector.extract_strided_slice %11 {offsets = [0, 0], sizes = [32, 1], strides = [1, 1]} : vector<64x1xf32> to vector<32x1xf32>
    %13 = vector.extract_strided_slice %11 {offsets = [32, 0], sizes = [32, 1], strides = [1, 1]} : vector<64x1xf32> to vector<32x1xf32>
    %14 = vector.broadcast %12 : vector<32x1xf32> to vector<32x256xf32>
    %15 = arith.subf %6, %14 : vector<32x256xf32>
    %16 = arith.mulf %15, %15 : vector<32x256xf32>
    %cst_8 = arith.constant dense<0.000000e+00> : vector<32xf32>
    %17 = vector.multi_reduction <add>, %16, %cst_8 [1] : vector<32x256xf32> to vector<32xf32>
    %18 = vector.shape_cast %17 : vector<32xf32> to vector<32x1xf32>
    %cst_9 = arith.constant 3.906250e-03 : f32
    %19 = vector.broadcast %cst_9 : f32 to vector<32x1xf32>
    %20 = arith.mulf %18, %19 : vector<32x1xf32>
    %cst_10 = arith.constant dense<0.000000e+00> : vector<32x1xf32>
    %21 = tpu.matmul %1, %20, %cst_10 {dimension_numbers = #tpu.dot_dimension_numbers<[1], [0], [0], [1], [0, 0, 1, 1], [], []>} : vector<32x32xf32>, vector<32x1xf32>, vector<32x1xf32> -> vector<32x1xf32>
    %cst_11 = arith.constant 9.99999974E-6 : f32
    %22 = vector.broadcast %cst_11 : f32 to vector<32x1xf32>
    %23 = arith.addf %21, %22 : vector<32x1xf32>
    %24 = math.rsqrt %23 : vector<32x1xf32>
    %25 = vector.broadcast %24 : vector<32x1xf32> to vector<32x256xf32>
    %26 = arith.mulf %15, %25 : vector<32x256xf32>
    %cst_12 = arith.constant dense<0.000000e+00> : vector<32x256xf32>
    %27 = tpu.matmul %2, %26, %cst_12 {dimension_numbers = #tpu.dot_dimension_numbers<[1], [0], [0], [1], [0, 0, 1, 1], [], []>} : vector<32x32xf32>, vector<32x256xf32>, vector<32x256xf32> -> vector<32x256xf32>
    %28 = vector.broadcast %13 : vector<32x1xf32> to vector<32x256xf32>
    %29 = arith.addf %27, %28 : vector<32x256xf32>
    %30 = vector.broadcast %3 : vector<32x1xf32> to vector<32x256xf32>
    %31 = arith.addf %29, %30 : vector<32x256xf32>
    %32 = arith.negf %31 : vector<32x256xf32>
    %33 = math.exp %32 : vector<32x256xf32>
    %cst_13 = arith.constant 1.000000e+00 : f32
    %34 = vector.broadcast %cst_13 : f32 to vector<32x256xf32>
    %35 = arith.addf %34, %33 : vector<32x256xf32>
    %36 = arith.divf %34, %35 : vector<32x256xf32>
    %37 = arith.mulf %6, %36 : vector<32x256xf32>
    %38 = arith.index_cast %c0_i32 : i32 to index
    %c0_14 = arith.constant 0 : index
    %c0_15 = arith.constant 0 : index
    %39 = vector.load %arg4[%38, %c0_14, %c0_15] : memref<4x32x256xf32, #tpu.memory_space<vmem>>, vector<1x32x256xf32>
    %40 = vector.shape_cast %39 : vector<1x32x256xf32> to vector<32x256xf32>
    %41 = vector.shape_cast %37 : vector<32x256xf32> to vector<1x32x256xf32>
    tpu.vector_store %arg4[%38, %c0_14, %c0_15], %41 {strides = array<i32>} : memref<4x32x256xf32, #tpu.memory_space<vmem>>, vector<1x32x256xf32>,
    %c1_i32 = arith.constant 1 : i32
    %42 = arith.index_cast %c1_i32 : i32 to index
    %c0_16 = arith.constant 0 : index
    %c0_17 = arith.constant 0 : index
    %43 = vector.load %arg1[%42, %c0_16, %c0_17] : memref<4x32x256xf32, #tpu.memory_space<vmem>>, vector<1x32x256xf32>
    %44 = vector.shape_cast %43 : vector<1x32x256xf32> to vector<32x256xf32>
    %cst_18 = arith.constant dense<0.000000e+00> : vector<32xf32>
    %45 = vector.multi_reduction <add>, %44, %cst_18 [1] : vector<32x256xf32> to vector<32xf32>
    %46 = vector.shape_cast %45 : vector<32xf32> to vector<32x1xf32>
    %cst_19 = arith.constant 3.906250e-03 : f32
    %47 = vector.broadcast %cst_19 : f32 to vector<32x1xf32>
    %48 = arith.mulf %46, %47 : vector<32x1xf32>
    %cst_20 = arith.constant dense<0.000000e+00> : vector<64x1xf32>
    %49 = tpu.matmul %0, %48, %cst_20 {dimension_numbers = #tpu.dot_dimension_numbers<[1], [0], [0], [1], [0, 0, 1, 1], [], []>} : vector<64x32xf32>, vector<32x1xf32>, vector<64x1xf32> -> vector<64x1xf32>
    %50 = vector.extract_strided_slice %49 {offsets = [0, 0], sizes = [32, 1], strides = [1, 1]} : vector<64x1xf32> to vector<32x1xf32>
    %51 = vector.extract_strided_slice %49 {offsets = [32, 0], sizes = [32, 1], strides = [1, 1]} : vector<64x1xf32> to vector<32x1xf32>
    %52 = vector.broadcast %50 : vector<32x1xf32> to vector<32x256xf32>
    %53 = arith.subf %44, %52 : vector<32x256xf32>
    %54 = arith.mulf %53, %53 : vector<32x256xf32>
    %cst_21 = arith.constant dense<0.000000e+00> : vector<32xf32>
    %55 = vector.multi_reduction <add>, %54, %cst_21 [1] : vector<32x256xf32> to vector<32xf32>
    %56 = vector.shape_cast %55 : vector<32xf32> to vector<32x1xf32>
    %cst_22 = arith.constant 3.906250e-03 : f32
    %57 = vector.broadcast %cst_22 : f32 to vector<32x1xf32>
    %58 = arith.mulf %56, %57 : vector<32x1xf32>
    %cst_23 = arith.constant dense<0.000000e+00> : vector<32x1xf32>
    %59 = tpu.matmul %1, %58, %cst_23 {dimension_numbers = #tpu.dot_dimension_numbers<[1], [0], [0], [1], [0, 0, 1, 1], [], []>} : vector<32x32xf32>, vector<32x1xf32>, vector<32x1xf32> -> vector<32x1xf32>
    %cst_24 = arith.constant 9.99999974E-6 : f32
    %60 = vector.broadcast %cst_24 : f32 to vector<32x1xf32>
    %61 = arith.addf %59, %60 : vector<32x1xf32>
    %62 = math.rsqrt %61 : vector<32x1xf32>
    %63 = vector.broadcast %62 : vector<32x1xf32> to vector<32x256xf32>
    %64 = arith.mulf %53, %63 : vector<32x256xf32>
    %cst_25 = arith.constant dense<0.000000e+00> : vector<32x256xf32>
    %65 = tpu.matmul %2, %64, %cst_25 {dimension_numbers = #tpu.dot_dimension_numbers<[1], [0], [0], [1], [0, 0, 1, 1], [], []>} : vector<32x32xf32>, vector<32x256xf32>, vector<32x256xf32> -> vector<32x256xf32>
    %66 = vector.broadcast %51 : vector<32x1xf32> to vector<32x256xf32>
    %67 = arith.addf %65, %66 : vector<32x256xf32>
    %68 = vector.broadcast %3 : vector<32x1xf32> to vector<32x256xf32>
    %69 = arith.addf %67, %68 : vector<32x256xf32>
    %70 = arith.negf %69 : vector<32x256xf32>
    %71 = math.exp %70 : vector<32x256xf32>
    %cst_26 = arith.constant 1.000000e+00 : f32
    %72 = vector.broadcast %cst_26 : f32 to vector<32x256xf32>
    %73 = arith.addf %72, %71 : vector<32x256xf32>
    %74 = arith.divf %72, %73 : vector<32x256xf32>
    %75 = arith.mulf %44, %74 : vector<32x256xf32>
    %76 = arith.index_cast %c1_i32 : i32 to index
    %c0_27 = arith.constant 0 : index
    %c0_28 = arith.constant 0 : index
    %77 = vector.load %arg4[%76, %c0_27, %c0_28] : memref<4x32x256xf32, #tpu.memory_space<vmem>>, vector<1x32x256xf32>
    %78 = vector.shape_cast %77 : vector<1x32x256xf32> to vector<32x256xf32>
    %79 = vector.shape_cast %75 : vector<32x256xf32> to vector<1x32x256xf32>
    tpu.vector_store %arg4[%76, %c0_27, %c0_28], %79 {strides = array<i32>} : memref<4x32x256xf32, #tpu.memory_space<vmem>>, vector<1x32x256xf32>,
    %c2_i32 = arith.constant 2 : i32
    %80 = arith.index_cast %c2_i32 : i32 to index
    %c0_29 = arith.constant 0 : index
    %c0_30 = arith.constant 0 : index
    %81 = vector.load %arg1[%80, %c0_29, %c0_30] : memref<4x32x256xf32, #tpu.memory_space<vmem>>, vector<1x32x256xf32>
    %82 = vector.shape_cast %81 : vector<1x32x256xf32> to vector<32x256xf32>
    %cst_31 = arith.constant dense<0.000000e+00> : vector<32xf32>
    %83 = vector.multi_reduction <add>, %82, %cst_31 [1] : vector<32x256xf32> to vector<32xf32>
    %84 = vector.shape_cast %83 : vector<32xf32> to vector<32x1xf32>
    %cst_32 = arith.constant 3.906250e-03 : f32
    %85 = vector.broadcast %cst_32 : f32 to vector<32x1xf32>
    %86 = arith.mulf %84, %85 : vector<32x1xf32>
    %cst_33 = arith.constant dense<0.000000e+00> : vector<64x1xf32>
    %87 = tpu.matmul %0, %86, %cst_33 {dimension_numbers = #tpu.dot_dimension_numbers<[1], [0], [0], [1], [0, 0, 1, 1], [], []>} : vector<64x32xf32>, vector<32x1xf32>, vector<64x1xf32> -> vector<64x1xf32>
    %88 = vector.extract_strided_slice %87 {offsets = [0, 0], sizes = [32, 1], strides = [1, 1]} : vector<64x1xf32> to vector<32x1xf32>
    %89 = vector.extract_strided_slice %87 {offsets = [32, 0], sizes = [32, 1], strides = [1, 1]} : vector<64x1xf32> to vector<32x1xf32>
    %90 = vector.broadcast %88 : vector<32x1xf32> to vector<32x256xf32>
    %91 = arith.subf %82, %90 : vector<32x256xf32>
    %92 = arith.mulf %91, %91 : vector<32x256xf32>
    %cst_34 = arith.constant dense<0.000000e+00> : vector<32xf32>
    %93 = vector.multi_reduction <add>, %92, %cst_34 [1] : vector<32x256xf32> to vector<32xf32>
    %94 = vector.shape_cast %93 : vector<32xf32> to vector<32x1xf32>
    %cst_35 = arith.constant 3.906250e-03 : f32
    %95 = vector.broadcast %cst_35 : f32 to vector<32x1xf32>
    %96 = arith.mulf %94, %95 : vector<32x1xf32>
    %cst_36 = arith.constant dense<0.000000e+00> : vector<32x1xf32>
    %97 = tpu.matmul %1, %96, %cst_36 {dimension_numbers = #tpu.dot_dimension_numbers<[1], [0], [0], [1], [0, 0, 1, 1], [], []>} : vector<32x32xf32>, vector<32x1xf32>, vector<32x1xf32> -> vector<32x1xf32>
    %cst_37 = arith.constant 9.99999974E-6 : f32
    %98 = vector.broadcast %cst_37 : f32 to vector<32x1xf32>
    %99 = arith.addf %97, %98 : vector<32x1xf32>
    %100 = math.rsqrt %99 : vector<32x1xf32>
    %101 = vector.broadcast %100 : vector<32x1xf32> to vector<32x256xf32>
    %102 = arith.mulf %91, %101 : vector<32x256xf32>
    %cst_38 = arith.constant dense<0.000000e+00> : vector<32x256xf32>
    %103 = tpu.matmul %2, %102, %cst_38 {dimension_numbers = #tpu.dot_dimension_numbers<[1], [0], [0], [1], [0, 0, 1, 1], [], []>} : vector<32x32xf32>, vector<32x256xf32>, vector<32x256xf32> -> vector<32x256xf32>
    %104 = vector.broadcast %89 : vector<32x1xf32> to vector<32x256xf32>
    %105 = arith.addf %103, %104 : vector<32x256xf32>
    %106 = vector.broadcast %3 : vector<32x1xf32> to vector<32x256xf32>
    %107 = arith.addf %105, %106 : vector<32x256xf32>
    %108 = arith.negf %107 : vector<32x256xf32>
    %109 = math.exp %108 : vector<32x256xf32>
    %cst_39 = arith.constant 1.000000e+00 : f32
    %110 = vector.broadcast %cst_39 : f32 to vector<32x256xf32>
    %111 = arith.addf %110, %109 : vector<32x256xf32>
    %112 = arith.divf %110, %111 : vector<32x256xf32>
    %113 = arith.mulf %82, %112 : vector<32x256xf32>
    %114 = arith.index_cast %c2_i32 : i32 to index
    %c0_40 = arith.constant 0 : index
    %c0_41 = arith.constant 0 : index
    %115 = vector.load %arg4[%114, %c0_40, %c0_41] : memref<4x32x256xf32, #tpu.memory_space<vmem>>, vector<1x32x256xf32>
    %116 = vector.shape_cast %115 : vector<1x32x256xf32> to vector<32x256xf32>
    %117 = vector.shape_cast %113 : vector<32x256xf32> to vector<1x32x256xf32>
    tpu.vector_store %arg4[%114, %c0_40, %c0_41], %117 {strides = array<i32>} : memref<4x32x256xf32, #tpu.memory_space<vmem>>, vector<1x32x256xf32>,
    %c3_i32 = arith.constant 3 : i32
    %118 = arith.index_cast %c3_i32 : i32 to index
    %c0_42 = arith.constant 0 : index
    %c0_43 = arith.constant 0 : index
    %119 = vector.load %arg1[%118, %c0_42, %c0_43] : memref<4x32x256xf32, #tpu.memory_space<vmem>>, vector<1x32x256xf32>
    %120 = vector.shape_cast %119 : vector<1x32x256xf32> to vector<32x256xf32>
    %cst_44 = arith.constant dense<0.000000e+00> : vector<32xf32>
    %121 = vector.multi_reduction <add>, %120, %cst_44 [1] : vector<32x256xf32> to vector<32xf32>
    %122 = vector.shape_cast %121 : vector<32xf32> to vector<32x1xf32>
    %cst_45 = arith.constant 3.906250e-03 : f32
    %123 = vector.broadcast %cst_45 : f32 to vector<32x1xf32>
    %124 = arith.mulf %122, %123 : vector<32x1xf32>
    %cst_46 = arith.constant dense<0.000000e+00> : vector<64x1xf32>
    %125 = tpu.matmul %0, %124, %cst_46 {dimension_numbers = #tpu.dot_dimension_numbers<[1], [0], [0], [1], [0, 0, 1, 1], [], []>} : vector<64x32xf32>, vector<32x1xf32>, vector<64x1xf32> -> vector<64x1xf32>
    %126 = vector.extract_strided_slice %125 {offsets = [0, 0], sizes = [32, 1], strides = [1, 1]} : vector<64x1xf32> to vector<32x1xf32>
    %127 = vector.extract_strided_slice %125 {offsets = [32, 0], sizes = [32, 1], strides = [1, 1]} : vector<64x1xf32> to vector<32x1xf32>
    %128 = vector.broadcast %126 : vector<32x1xf32> to vector<32x256xf32>
    %129 = arith.subf %120, %128 : vector<32x256xf32>
    %130 = arith.mulf %129, %129 : vector<32x256xf32>
    %cst_47 = arith.constant dense<0.000000e+00> : vector<32xf32>
    %131 = vector.multi_reduction <add>, %130, %cst_47 [1] : vector<32x256xf32> to vector<32xf32>
    %132 = vector.shape_cast %131 : vector<32xf32> to vector<32x1xf32>
    %cst_48 = arith.constant 3.906250e-03 : f32
    %133 = vector.broadcast %cst_48 : f32 to vector<32x1xf32>
    %134 = arith.mulf %132, %133 : vector<32x1xf32>
    %cst_49 = arith.constant dense<0.000000e+00> : vector<32x1xf32>
    %135 = tpu.matmul %1, %134, %cst_49 {dimension_numbers = #tpu.dot_dimension_numbers<[1], [0], [0], [1], [0, 0, 1, 1], [], []>} : vector<32x32xf32>, vector<32x1xf32>, vector<32x1xf32> -> vector<32x1xf32>
    %cst_50 = arith.constant 9.99999974E-6 : f32
    %136 = vector.broadcast %cst_50 : f32 to vector<32x1xf32>
    %137 = arith.addf %135, %136 : vector<32x1xf32>
    %138 = math.rsqrt %137 : vector<32x1xf32>
    %139 = vector.broadcast %138 : vector<32x1xf32> to vector<32x256xf32>
    %140 = arith.mulf %129, %139 : vector<32x256xf32>
    %cst_51 = arith.constant dense<0.000000e+00> : vector<32x256xf32>
    %141 = tpu.matmul %2, %140, %cst_51 {dimension_numbers = #tpu.dot_dimension_numbers<[1], [0], [0], [1], [0, 0, 1, 1], [], []>} : vector<32x32xf32>, vector<32x256xf32>, vector<32x256xf32> -> vector<32x256xf32>
    %142 = vector.broadcast %127 : vector<32x1xf32> to vector<32x256xf32>
    %143 = arith.addf %141, %142 : vector<32x256xf32>
    %144 = vector.broadcast %3 : vector<32x1xf32> to vector<32x256xf32>
    %145 = arith.addf %143, %144 : vector<32x256xf32>
    %146 = arith.negf %145 : vector<32x256xf32>
    %147 = math.exp %146 : vector<32x256xf32>
    %cst_52 = arith.constant 1.000000e+00 : f32
    %148 = vector.broadcast %cst_52 : f32 to vector<32x256xf32>
    %149 = arith.addf %148, %147 : vector<32x256xf32>
    %150 = arith.divf %148, %149 : vector<32x256xf32>
    %151 = arith.mulf %120, %150 : vector<32x256xf32>
    %152 = arith.index_cast %c3_i32 : i32 to index
    %c0_53 = arith.constant 0 : index
    %c0_54 = arith.constant 0 : index
    %153 = vector.load %arg4[%152, %c0_53, %c0_54] : memref<4x32x256xf32, #tpu.memory_space<vmem>>, vector<1x32x256xf32>
    %154 = vector.shape_cast %153 : vector<1x32x256xf32> to vector<32x256xf32>
    %155 = vector.shape_cast %151 : vector<32x256xf32> to vector<1x32x256xf32>
    tpu.vector_store %arg4[%152, %c0_53, %c0_54], %155 {strides = array<i32>} : memref<4x32x256xf32, #tpu.memory_space<vmem>>, vector<1x32x256xf32>,
    %c4_i32 = arith.constant 4 : i32
    return
  }
  func.func @transform_0(%arg0: i32) -> (i32, i32, i32) {
    %c0_i32 = arith.constant 0 : i32
    %c0_i32_0 = arith.constant 0 : i32
    %c0_i32_1 = arith.constant 0 : i32
    return %arg0, %c0_i32, %c0_i32_0 : i32, i32, i32
  }
  func.func @transform_1(%arg0: i32) -> (i32, i32) {
    %c0_i32 = arith.constant 0 : i32
    %c0_i32_0 = arith.constant 0 : i32
    %c0_i32_1 = arith.constant 0 : i32
    return %c0_i32, %c0_i32_0 : i32, i32
  }
  func.func @transform_2(%arg0: i32) -> (i32, i32) {
    %c0_i32 = arith.constant 0 : i32
    %c0_i32_0 = arith.constant 0 : i32
    %c0_i32_1 = arith.constant 0 : i32
    return %c0_i32, %c0_i32_0 : i32, i32
  }
  func.func @transform_3(%arg0: i32) -> (i32, i32, i32) {
    %c0_i32 = arith.constant 0 : i32
    %c0_i32_0 = arith.constant 0 : i32
    %c0_i32_1 = arith.constant 0 : i32
    return %arg0, %c0_i32, %c0_i32_0 : i32, i32, i32
  }
}

</mosaic_0001>

<bundles_post_ra>
// kernel: tpu_custom_call.1
= control target key start
LH: loop header
LB: loop body
LE: loop exit
PB: predicated region body
PF: predicated region fallthrough
CT: control target
= control target key end

     0   :  { %8 = vsyncpa [#allocation3], 0  ;;  %s3940_s0 = inlined_call_operand.hbm [shape: f32[16,32,256], index: 0, kind: input, shape index: {}]   ;;  %s3941_s1 = inlined_call_operand.vmem [shape: f32[96,32], index: 1, kind: input, shape index: {}]   ;;  %s3942_s2 = inlined_call_operand.vmem [shape: f32[32,1], index: 2, kind: input, shape index: {}]   ;;  %s3943_s3 = inlined_call_operand.hbm [shape: f32[16,32,256], index: 3, kind: output, shape index: {}]  }
   0x1   :  { %10 = vsyncpa [#allocation3 + $0x1], 0 }
   0x2   :  { %11 = vsyncpa [#allocation4], 0 }
   0x3   :  { %13 = vsyncpa [#allocation4 + $0x1], 0  ;;  %s3035_s12 = smov 0   ;;  %s3037_s13 = smov 0  }
   0x4   :  { %s3039_s14 = smov 0   ;;  %s3041_s15 = smov 0  }
   0x5 LB: > { %s3056_s16 = sadd.s32 4294967295, %s3005_s15   ;;  %s2275_s17 = sadd.s32 4294967294, %s3005_s15   ;;  %s3005_s15 = sphi %s3041_s15, %s3957_s15   ;;  %s3001_s14 = sphi %s3039_s14, %s3956_s14   ;;  %s2997_s13 = sphi %s3037_s13, %s3955_s13   ;;  %s2993_s12 = sphi %s3035_s12, %s3954_s12  }
   0x6   : > { %s3060_s18 = sadd.s32 1, %s3005_s15   ;;  %s26_s19 = sadd.s32 1, %s3001_s14 }
   0x7   : > { %s23_s20 = ssub.s32 %s3005_s15, %s3060_s18  ;;  %p33_p0 = scmp.ne.s32.totalorder %s3001_s14, %s2997_s13 }
   0x8   : > { %p24_p1 = scmp.eq.s32.totalorder %s23_s20, 0  ;;  %p34_p2 = scmp.eq.s32.totalorder %s3005_s15, 0 }
   0x9   : > { %p39_p3 = scmp.ne.s32.totalorder %s2997_s13, %s2993_s12  ;;  %p40_p4 = scmp.eq.s32.totalorder %s3056_s16, 0 }
   0xa   : > { %s3072_s21 = scalar_select %p24_p1, %s3001_s14, %s26_s19  }
   0xb   : > { %p3074_p5 = por %p34_p2, %p33_p0  ;;  %p3078_p6 = por %p40_p4, %p39_p3 }
   0xc   : > { %p105_p7 = scmp.eq.s32.totalorder %s3056_s16, 3  ;;  %p111_p8 = scmp.eq.s32.totalorder %s2275_s17, 3 }
   0xd   : > { %s3947_s23 = scalar_select %p3078_p6, 1, 0 }
   0xe   : > { %p2675_p9 = scmp.lt.s32.totalorder %s3005_s15, 4  ;;  %p3084_p10 = por %p105_p7, %p33_p0 }
   0xf   : > { %p3088_p11 = por %p111_p8, %p39_p3  ;;  %s137_s26 = sand.u32 1, %s3001_s14  }
  0x10   : > { %s3948_s24 = scalar_select %p3084_p10, 1, 0 }
  0x11   : > { %s3949_s25 = scalar_select %p3088_p11, 1, 0 }
  0x12   : > { %s2436_s27 = sshll.u32 %s3005_s15, 12  ;;  %s2278_s28 = sshll.u32 %s137_s26, 8 }
  0x13   : > { %s3097_s4 = scalar_lea.hbm %s3940_s0, %s2436_s27  ;;  %s141_s5 = scalar_lea.vmem [#allocation2], %s2278_s28 }
  0x14   : > { %s149_s6 = sshll.u32 %s141_s5, 4  ;;  %p3101_p12 = pnand %p2675_p9, %p3074_p5  ;;  %s3105_s6 = int_to_ptr.vmem [resolvable:$true] %s149_s6 }
  0x15   : > { %s3107_s8 = scalar_lea.sflag [#allocation3], %s137_s26  ;;  %s2913_s9 = scalar_lea.hbm %s3097_s4, 4096 }
  0x16   : > { %p2914_p13 = scmp.ne.s32.totalorder %s3097_s4, %s2913_s9  ;;  %p2915_p0 = pneg %p3101_p12 }
  0x17   : > { %s2918_s17 = scalar_lea.hbm %s3940_s0, 16384  ;;  %p2919_p3 = scmp.lt.s32.totalorder %s3097_s4, %s3940_s0 }
  0x18   : > { %p2916_p1 = pnand %p2915_p0, %p2914_p13  ;;  %p2920_p4 = scmp.lt.s32.totalorder %s2918_s17, %s2913_s9 }
  0x1a   : > { %p2917_p2 = pneg %p2916_p1  ;;  %p2921_p5 = por %p2920_p4, %p2919_p3 }
  0x1c   : > { %p2922_p7 = pnand %p2921_p5, %p2917_p2 }
  0x1e   : > { %2925 = shalt.err (!%p2922_p7)
}
  0x1f   : > { %s2926_s22 = scalar_lea.vmem %s3105_s6, 4096  ;;  %s3007_s26 = smov [#allocation2]  }
  0x20   : > { %p2927_p8 = scmp.ne.s32.totalorder %s3105_s6, %s2926_s22  ;;  %s2931_s27 = sshll.u32 %s3007_s26, 4  ;;  %s2932_s27 = int_to_ptr.vmem [resolvable:$false] %s2931_s27 }
  0x21   : > { %s2933_s28 = scalar_lea.vmem %s2932_s27, 8192  ;;  %p2934_p1 = scmp.lt.s32.totalorder %s3105_s6, %s2932_s27 }
  0x22   : > { %p2929_p9 = pnand %p2927_p8, %p2915_p0  ;;  %p2935_p11 = scmp.lt.s32.totalorder %s2933_s28, %s2926_s22 }
  0x24   : > { %p2930_p13 = pneg %p2929_p9  ;;  %p2936_p10 = por %p2935_p11, %p2934_p1 }
  0x26   : > { %p2937_p6 = pnand %p2936_p10, %p2930_p13 }
  0x28   : > { %2940 = shalt.err (!%p2937_p6)
}
  0x29   : > { %s3008_s29 = smov 256   ;;  %s3009_s30 = smov 16  }
  0x2a   : > { %2670 = dma.hbm_to_vmem [thread:$0]  (!%p3101_p12), %s3097_s4, 4096, %s3105_s6, %s3107_s8, %s3008_s29, %s3008_s29, %s3009_s30  }
  0x2b   : > { %p2282_p0 = scmp.ge.s32.totalorder %s3005_s15, 1  ;;  %p157_p2 = scmp.lt.s32.totalorder %s3005_s15, 5 }
  0x2d   : > { %p158_p3 = pnand %p2282_p0, %p157_p2 }
  0x2e   : > { %s3131_s5 = sand.u32 (!%p158_p3), 1, %s2997_s13   ;;  %p3951_p6 = scmp.ne.s32.totalorder (!%p158_p3), %s3947_s23, 0 }
  0x2f   : > { %161 = sbr.rel (%p158_p3) target bundleno = 2709 (0xa95), region = 32  ;;  %s2283_s9 = sshll.u32 (!%p158_p3), %s3131_s5, 8 }
  0x30   : > { %s164_s10 = scalar_lea.sflag (!%p158_p3), [#allocation3], %s3131_s5  ;;  %s3137_s11 = scalar_lea.vmem (!%p158_p3), [#allocation2], %s2283_s9 }
  0x34   : > { %2984 = dma.done.wait (%p3951_p6), %s164_s10, 4096  }
  0x35   : > { %2986 = vsyncadd (%p3951_p6), %s164_s10, 4294963200  ;;  %v3144_v0 = vld [vmem:[%s3137_s11 + $0x30] sm:$0xff]  ;;  %v3147_v1 = vld [vmem:[%s3137_s11 + $0x38] sm:$0xff]  ;;  %vm232_vm0 = vcmask 261120   ;;  %v3010_v13 = vmov 0   ;;  %s3819_s27 = scalar_lea.vmem [#allocation5], %s2283_s9 }
  0x36   : > { %v3150_v2 = vld [vmem:[%s3137_s11 + $0x20] sm:$0xff]  ;;  %v225_v3 = vadd.f32 %v3147_v1, %v3144_v0  ;;  %v3155_v4 = vld [vmem:[%s3137_s11 + $0x28] sm:$0xff]  ;;  %v3158_v5 = vld [vmem:[%s3137_s11 + $0x10] sm:$0xff]  ;;  %2716 = vset.pattern.permute.xlu1 %v3010_v13  ;;  %2715 = vset.pattern.permute.xlu0 %v3010_v13  ;;  %s2438_s9 = sshll.u32 %s3056_s16, 12  ;;  %s2202_s28 = sshll.u32 %s3819_s27, 4  ;;  %s3895_s28 = int_to_ptr.vmem [resolvable:$true] %s2202_s28 }
  0x37   : > { %v3161_v6 = vld [vmem:[%s3137_s11 + $0x18] sm:$0xff]  ;;  %v3166_v8 = vld [vmem:[%s3137_s11] sm:$0xff]  ;;  %v3169_v9 = vld [vmem:[%s3137_s11 + $0x8] sm:$0xff]  ;;  %v222_v10 = vadd.f32 %v3155_v4, %v3150_v2  ;;  %s3893_s10 = scalar_lea.hbm %s3943_s3, %s2438_s9  ;;  %s2188_s16 = scalar_lea.sflag [#allocation4], %s3131_s5 }
  0x38   : > { %v219_v7 = vadd.f32 %v3161_v6, %v3158_v5  ;;  %226 = vadd.xlane.f32.xlu0 %v225_v3  ;;  %v216_v11 = vadd.f32 %v3169_v9, %v3166_v8  ;;  %v3178_v12 = vld [vmem:[%s3941_s1] sm:$0xff]  ;;  %v3185_v22 = vld [vmem:[%s3941_s1 + $0x8] sm:$0xff]  ;;  %v3190_v23 = vld [vmem:[%s3941_s1 + $0x10] sm:$0xff]  ;;  %s2941_s23 = scalar_lea.vmem %s3895_s28, 4096  ;;  %p3952_p11 = scmp.ne.s32.totalorder %s3948_s24, 0 }
  0x39   : > { %2527 = vmatprep.mubr.msk.f32.mxu0 %vm232_vm0, %v3178_v12  ;;  %v3199_v24 = vld [vmem:[%s3941_s1 + $0x18] sm:$0xff]  ;;  %v3206_v29 = vld [vmem:[%s3137_s11 + $0x60] sm:$0xff]  ;;  %v3209_v30 = vld [vmem:[%s3137_s11 + $0x68] sm:$0xff]  ;;  %p2942_p10 = scmp.ne.s32.totalorder %s3895_s28, %s2941_s23  ;;  %s3012_s4 = smov [#allocation5]  }
  0x3a   : > { %220 = vadd.xlane.f32.xlu1 %v219_v7  ;;  %v759_v31 = vadd.f32 %v3209_v30, %v3206_v29  ;;  %v3214_v32 = vld [vmem:[%s3137_s11 + $0x70] sm:$0xff]  ;;  %v3217_v33 = vld [vmem:[%s3137_s11 + $0x78] sm:$0xff]  ;;  %v3230_v38 = vld [vmem:[%s3137_s11 + $0x40] sm:$0xff]  ;;  %s2945_s6 = sshll.u32 %s3012_s4, 4  ;;  %s2946_s6 = int_to_ptr.vmem [resolvable:$false] %s2945_s6 }
  0x3b   : > { %v762_v34 = vadd.f32 %v3217_v33, %v3214_v32  ;;  %v3222_v35 = vld [vmem:[%s3137_s11 + $0x50] sm:$0xff]  ;;  %v3225_v36 = vld [vmem:[%s3137_s11 + $0x58] sm:$0xff]  ;;  %v3233_v39 = vld [vmem:[%s3137_s11 + $0x48] sm:$0xff]  ;;  %p2943_p12 = pnand %p2942_p10, %p3952_p11  ;;  %s2947_s7 = scalar_lea.vmem %s2946_s6, 8192 }
  0x3c   : > { %223 = vadd.xlane.f32.xlu0 %v222_v10  ;;  %v756_v37 = vadd.f32 %v3225_v36, %v3222_v35  ;;  %v753_v40 = vadd.f32 %v3233_v39, %v3230_v38  ;;  %v3294_v3 = vld [vmem:[%s3941_s1 + $0x30] sm:$0xff]  ;;  %p2948_p5 = scmp.lt.s32.totalorder %s3895_s28, %s2946_s6  ;;  %p2949_p7 = scmp.lt.s32.totalorder %s2947_s7, %s2941_s23 }
  0x3d   : > { %p2944_p4 = pneg %p2943_p12 }
  0x3e   : > { %217 = vadd.xlane.f32.xlu1 %v216_v11  ;;  %p2950_p8 = por %p2949_p7, %p2948_p5 }
  0x40   : > { %p2951_p9 = pnand %p2950_p8, %p2944_p4 }
  0xc1   : > { %v227_v14 = vpop.xlane.xlu0 %226 }
  0xc2   : > { %v231_v15 = vmul.f32 0.00390625, %v227_v14 }
  0xc3   : > { %v221_v16 = vpop.xlane.xlu1 %220 }
  0xc4   : > { %2519 = vmatprep.subr.mxu0 %v231_v15  ;;  %2655 = vmatprep.subr.mxu1 %v231_v15  ;;  %v229_v20 = vmul.f32 0.00390625, %v221_v16 }
  0xc5   : > { %2520 = vmatpush3.msra.mxu0 %v231_v15  ;;  %2659 = vmatpush3.msra.mxu1 %v231_v15  ;;  %v224_v17 = vpop.xlane.xlu0 %223 }
  0xc6   : > { %v230_v18 = vmul.f32 0.00390625, %v224_v17 }
  0xc7   : > { %v218_v19 = vpop.xlane.xlu1 %217 }
  0xc8   : > { %2521 = vmatprep.subr.mxu0 %v230_v18  ;;  %2656 = vmatprep.subr.mxu1 %v230_v18  ;;  %v228_v21 = vmul.f32 0.00390625, %v218_v19 }
  0xc9   : > { %2522 = vmatpush3.msra.mxu0 %v230_v18  ;;  %2660 = vmatpush3.msra.mxu1 %v230_v18 }
  0xca   : > { %2523 = vmatprep.subr.mxu0 %v229_v20  ;;  %2657 = vmatprep.subr.mxu1 %v229_v20 }
  0xcb   : > { %2524 = vmatpush3.msra.mxu0 %v229_v20  ;;  %2661 = vmatpush3.msra.mxu1 %v229_v20 }
  0xcc   : > { %2525 = vmatprep.subr.mxu0 %v228_v21  ;;  %2658 = vmatprep.subr.mxu1 %v228_v21 }
  0xcd   : > { %2526 = vmatpush3.msra.mxu0 %v228_v21  ;;  %2662 = vmatpush3.msra.mxu1 %v228_v21 }
  0xce   : > { %2528 = vmatmul.mubr.msk.f32.vlgmr.msra.gmra.mxu0 %vm232_vm0, %v3185_v22 }
  0xcf   : > { %2530 = vmatprep.mubr.msk.f32.mxu0 %vm232_vm0, %v3190_v23 }
  0xd2   : > { %2531 = vmatmul.mubr.msk.f32.gmra.mxu0 %vm232_vm0, %v3199_v24 }
  0xd3   : > { %2561 = vmatprep.mubr.msk.f32.mxu0 %vm232_vm0, %v3178_v12 }
 0x18e   : > { %v2529_v25 = vpop.f32.mrf.mxu0 }
 0x18f   : > { %369 = vperm.xlu1 %2716, %v2529_v25  }
 0x190   : > { %v323_v26 = vpop.f32.mrf.mxu0 }
 0x192   : > { %v2532_v27 = vpop.f32.mrf.mxu0 }
 0x193   : > { %379 = vperm.xlu0 %2715, %v2532_v27  }
 0x194   : > { %v333_v28 = vpop.f32.mrf.mxu0 }
 0x195   : > { %374 = vperm.xlu1 %2716, %v333_v28  }
 0x199   : > { %364 = vperm.xlu1 %2716, %v323_v26  }
 0x1b2   : > { %760 = vadd.xlane.f32.xlu0 %v759_v31 }
 0x1bd   : > { %763 = vadd.xlane.f32.xlu1 %v762_v34 }
 0x1c1   : > { %757 = vadd.xlane.f32.xlu1 %v756_v37 }
 0x1c5   : > { %754 = vadd.xlane.f32.xlu1 %v753_v40 }
 0x20a   : > { %v370_v41 = vpop.permute.xlu1 %369 }
 0x20b   : > { %v3238_v42 = vsub.f32 %v3158_v5, %v370_v41  ;;  %v3241_v43 = vsub.f32 %v3161_v6, %v370_v41 }
 0x20d   : > { %v392_v44 = vmul.f32 %v3238_v42, %v3238_v42  ;;  %v393_v45 = vmul.f32 %v3241_v43, %v3241_v43 }
 0x20e   : > { %v380_v46 = vpop.permute.xlu0 %379 }
 0x20f   : > { %v3248_v47 = vsub.f32 %v3144_v0, %v380_v46  ;;  %v3251_v48 = vsub.f32 %v3147_v1, %v380_v46  ;;  %v401_v49 = vadd.f32 %v393_v45, %v392_v44  ;;  %v3280_v1 = vld [vmem:[%s3941_s1 + $0x20] sm:$0xff] }
 0x210   : > { %v375_v50 = vpop.permute.xlu1 %374  ;;  %2533 = vmatprep.mubr.msk.f32.mxu1 %vm232_vm0, %v3280_v1 }
 0x211   : > { %v3254_v51 = vsub.f32 %v3150_v2, %v375_v50  ;;  %v3257_v52 = vsub.f32 %v3155_v4, %v375_v50  ;;  %402 = vadd.xlane.f32.xlu0 %v401_v49  ;;  %v396_v53 = vmul.f32 %v3248_v47, %v3248_v47  ;;  %v397_v54 = vmul.f32 %v3251_v48, %v3251_v48  ;;  %v3287_v2 = vld [vmem:[%s3941_s1 + $0x28] sm:$0xff]  ;;  %v3299_v4 = vld [vmem:[%s3941_s1 + $0x38] sm:$0xff] }
 0x212   : > { %2534 = vmatmul.mubr.msk.f32.vlgmr.msra.gmra.mxu1 %vm232_vm0, %v3287_v2 }
 0x213   : > { %v407_v55 = vadd.f32 %v397_v54, %v396_v53  ;;  %v394_v56 = vmul.f32 %v3254_v51, %v3254_v51  ;;  %v395_v57 = vmul.f32 %v3257_v52, %v3257_v52  ;;  %2536 = vmatprep.mubr.msk.f32.mxu1 %vm232_vm0, %v3294_v3 }
 0x214   : > { %v365_v58 = vpop.permute.xlu1 %364 }
 0x215   : > { %v3268_v59 = vsub.f32 %v3166_v8, %v365_v58  ;;  %v3271_v60 = vsub.f32 %v3169_v9, %v365_v58  ;;  %408 = vadd.xlane.f32.xlu1 %v407_v55  ;;  %v404_v61 = vadd.f32 %v395_v57, %v394_v56 }
 0x216   : > { %2537 = vmatmul.mubr.msk.f32.gmra.mxu1 %vm232_vm0, %v3299_v4 }
 0x217   : > { %v390_v62 = vmul.f32 %v3268_v59, %v3268_v59  ;;  %v391_v63 = vmul.f32 %v3271_v60, %v3271_v60  ;;  %2547 = vmatprep.mubr.msk.f32.mxu1 %vm232_vm0, %v3178_v12 }
 0x219   : > { %405 = vadd.xlane.f32.xlu1 %v404_v61  ;;  %v398_v0 = vadd.f32 %v391_v63, %v390_v62 }
 0x21d   : > { %399 = vadd.xlane.f32.xlu1 %v398_v0 }
 0x23b   : > { %v761_v5 = vpop.xlane.xlu0 %760 }
 0x23c   : > { %v767_v8 = vmul.f32 0.00390625, %v761_v5 }
 0x246   : > { %v764_v6 = vpop.xlane.xlu1 %763 }
 0x247   : > { %v768_v7 = vmul.f32 0.00390625, %v764_v6  ;;  %v3369_v6 = vld [vmem:[%s3137_s11 + $0xb8] sm:$0xff] }
 0x249   : > { %2553 = vmatprep.subr.mxu0 %v768_v7 }
 0x24a   : > { %2554 = vmatpush3.msra.mxu0 %v768_v7  ;;  %v758_v9 = vpop.xlane.xlu1 %757 }
 0x24b   : > { %v766_v10 = vmul.f32 0.00390625, %v758_v9  ;;  %2555 = vmatprep.subr.mxu0 %v767_v8 }
 0x24c   : > { %2556 = vmatpush3.msra.mxu0 %v767_v8 }
 0x24d   : > { %2557 = vmatprep.subr.mxu0 %v766_v10 }
 0x24e   : > { %2558 = vmatpush3.msra.mxu0 %v766_v10  ;;  %v755_v11 = vpop.xlane.xlu1 %754 }
 0x24f   : > { %v765_v13 = vmul.f32 0.00390625, %v755_v11 }
 0x251   : > { %2559 = vmatprep.subr.mxu0 %v765_v13 }
 0x252   : > { %2560 = vmatpush3.msra.mxu0 %v765_v13 }
 0x253   : > { %2562 = vmatmul.mubr.msk.f32.vlgmr.msra.gmra.mxu0 %vm232_vm0, %v3185_v22 }
 0x254   : > { %2564 = vmatprep.mubr.msk.f32.mxu0 %vm232_vm0, %v3190_v23 }
 0x257   : > { %2565 = vmatmul.mubr.msk.f32.gmra.mxu0 %vm232_vm0, %v3199_v24 }
 0x258   : > { %2567 = vmatprep.mubr.msk.f32.mxu0 %vm232_vm0, %v3280_v1 }
 0x25b   : > { %2568 = vmatmul.mubr.msk.f32.gmra.mxu0 %vm232_vm0, %v3287_v2 }
 0x25c   : > { %2570 = vmatprep.mubr.msk.f32.mxu0 %vm232_vm0, %v3294_v3 }
 0x25f   : > { %2571 = vmatmul.mubr.msk.f32.gmra.mxu0 %vm232_vm0, %v3299_v4 }
 0x29a   : > { %v403_v16 = vpop.xlane.xlu0 %402 }
 0x29b   : > { %v411_v19 = vmul.f32 0.00390625, %v403_v16 }
 0x29e   : > { %v409_v14 = vpop.xlane.xlu1 %408 }
 0x29f   : > { %v413_v15 = vmul.f32 0.00390625, %v409_v14 }
 0x2a1   : > { %2539 = vmatprep.subr.mxu1 %v413_v15 }
 0x2a2   : > { %2540 = vmatpush3.msra.mxu1 %v413_v15  ;;  %v406_v17 = vpop.xlane.xlu1 %405 }
 0x2a3   : > { %v412_v18 = vmul.f32 0.00390625, %v406_v17 }
 0x2a5   : > { %2541 = vmatprep.subr.mxu1 %v412_v18 }
 0x2a6   : > { %2542 = vmatpush3.msra.mxu1 %v412_v18  ;;  %v400_v20 = vpop.xlane.xlu1 %399  ;;  %v3011_v18 = vmov 0.0  }
 0x2a7   : > { %v410_v21 = vmul.f32 0.00390625, %v400_v20  ;;  %2543 = vmatprep.subr.mxu1 %v411_v19  ;;  %1127 = vmatprep.mubr.f32.mxu0 %v3011_v18 }
 0x2a8   : > { %2544 = vmatpush3.msra.mxu1 %v411_v19 }
 0x2a9   : > { %2545 = vmatprep.subr.mxu1 %v410_v21 }
 0x2aa   : > { %2546 = vmatpush3.msra.mxu1 %v410_v21 }
 0x2ab   : > { %2548 = vmatmul.mubr.msk.f32.vlgmr.msra.gmra.mxu1 %vm232_vm0, %v3185_v22 }
 0x2ac   : > { %2550 = vmatprep.mubr.msk.f32.mxu1 %vm232_vm0, %v3190_v23 }
 0x2af   : > { %2551 = vmatmul.mubr.msk.f32.gmra.mxu1 %vm232_vm0, %v3199_v24 }
 0x2b0   : > { %627 = vmatprep.mubr.f32.mxu1 %v3011_v18 }
 0x2d2   : > { %v3327_v31 = vpop.f32.mrf.mxu1 }
 0x2d4   : > { %v3329_v34 = vpop.f32.mrf.mxu1 }
 0x2d6   : > { %v3331_v37 = vpop.f32.mrf.mxu1 }
 0x2d8   : > { %v3333_v40 = vpop.f32.mrf.mxu1 }
 0x313   : > { %v2563_v25 = vpop.f32.mrf.mxu0 }
 0x315   : > { %v835_v26 = vpop.f32.mrf.mxu0 }
 0x317   : > { %v2566_v27 = vpop.f32.mrf.mxu0 }
 0x318   : > { %891 = vperm.xlu0 %2715, %v2566_v27   ;;  %v3389_v27 = vld [vmem:[%s3137_s11 + $0xa8] sm:$0xff] }
 0x319   : > { %v845_v28 = vpop.f32.mrf.mxu0 }
 0x31a   : > { %886 = vperm.xlu1 %2716, %v845_v28  }
 0x31c   : > { %876 = vperm.xlu0 %2715, %v835_v26   ;;  %v3386_v26 = vld [vmem:[%s3137_s11 + $0xa0] sm:$0xff] }
 0x31e   : > { %881 = vperm.xlu1 %2716, %v2563_v25  }
 0x36b   : > { %v2549_v41 = vpop.f32.mrf.mxu1 }
 0x36c   : > { %v486_v55 = vadd.f32 1e-05, %v2549_v41  ;;  %v1240_v41 = vadd.f32 %v3389_v27, %v3386_v26 }
 0x36d   : > { %v480_v49 = vpop.f32.mrf.mxu1 }
 0x36e   : > { %2717 = vrsqrt.f32 %v486_v55  ;;  %v481_v11 = vadd.f32 1e-05, %v480_v49  ;;  %v3402_v49 = vld [vmem:[%s3137_s11 + $0x90] sm:$0xff] }
 0x36f   : > { %v2552_v57 = vpop.f32.mrf.mxu1 }
 0x370   : > { %v496_v63 = vadd.f32 1e-05, %v2552_v57 }
 0x371   : > { %v490_v13 = vpop.f32.mrf.mxu1 }
 0x372   : > { %2719 = vrsqrt.f32 %v496_v63  ;;  %v491_v14 = vadd.f32 1e-05, %v490_v13 }
 0x373   : > { %2721 = vrsqrt.f32 %v481_v11 }
 0x374   : > { %2723 = vrsqrt.f32 %v491_v14 }
 0x37b   : > { %v2718_v9 = vpop.eup %2717 }
 0x37f   : > { %v2720_v10 = vpop.eup %2719 }
 0x380   : > { %v2722_v15 = vpop.eup %2721 }
 0x381   : > { %v2724_v16 = vpop.eup %2723 }
 0x393   : > { %v892_v44 = vpop.permute.xlu0 %891 }
 0x394   : > { %v3336_v45 = vsub.f32 %v3214_v32, %v892_v44  ;;  %v3339_v46 = vsub.f32 %v3217_v33, %v892_v44  ;;  %v3397_v44 = vld [vmem:[%s3137_s11 + $0x88] sm:$0xff] }
 0x395   : > { %v887_v50 = vpop.permute.xlu1 %886 }
 0x396   : > { %v908_v53 = vmul.f32 %v3336_v45, %v3336_v45  ;;  %v909_v54 = vmul.f32 %v3339_v46, %v3339_v46  ;;  %v3346_v32 = vsub.f32 %v3206_v29, %v887_v50  ;;  %v3349_v33 = vsub.f32 %v3209_v30, %v887_v50  ;;  %v3405_v50 = vld [vmem:[%s3137_s11 + $0x98] sm:$0xff] }
 0x397   : > { %v877_v17 = vpop.permute.xlu0 %876 }
 0x398   : > { %v919_v56 = vadd.f32 %v909_v54, %v908_v53  ;;  %v906_v30 = vmul.f32 %v3346_v32, %v3346_v32  ;;  %v3376_v19 = vsub.f32 %v3230_v38, %v877_v17  ;;  %v3379_v20 = vsub.f32 %v3233_v39, %v877_v17  ;;  %v3394_v38 = vld [vmem:[%s3137_s11 + $0x80] sm:$0xff] }
 0x399   : > { %v882_v58 = vpop.permute.xlu1 %881  ;;  %v1234_v39 = vadd.f32 %v3397_v44, %v3394_v38  ;;  %v1237_v53 = vadd.f32 %v3405_v50, %v3402_v49 }
 0x39a   : > { %v3352_v61 = vsub.f32 %v3222_v35, %v882_v58  ;;  %v3355_v62 = vsub.f32 %v3225_v36, %v882_v58  ;;  %920 = vadd.xlane.f32.xlu1 %v919_v56  ;;  %v907_v35 = vmul.f32 %v3349_v33, %v3349_v33  ;;  %v3366_v36 = vld [vmem:[%s3137_s11 + $0xb0] sm:$0xff]  ;;  %v902_v21 = vmul.f32 %v3376_v19, %v3376_v19 }
 0x39b   : > { %v1243_v8 = vadd.f32 %v3369_v6, %v3366_v36  ;;  %v903_v25 = vmul.f32 %v3379_v20, %v3379_v20 }
 0x39c   : > { %v904_v0 = vmul.f32 %v3352_v61, %v3352_v61  ;;  %v905_v5 = vmul.f32 %v3355_v62, %v3355_v62  ;;  %v916_v7 = vadd.f32 %v907_v35, %v906_v30 }
 0x39d   : > { %v910_v28 = vadd.f32 %v903_v25, %v902_v21 }
 0x39e   : > { %v913_v29 = vadd.f32 %v905_v5, %v904_v0 }
 0x3a0   : > { %914 = vadd.xlane.f32.xlu0 %v913_v29 }
 0x3a4   : > { %917 = vadd.xlane.f32.xlu0 %v916_v7 }
 0x3a8   : > { %1244 = vadd.xlane.f32.xlu0 %v1243_v8 }
 0x3ab   : > { %510 = vperm.xlu1 %2716, %v2718_v9  }
 0x3af   : > { %520 = vperm.xlu1 %2716, %v2720_v10   ;;  %v3420_v10 = vld [vmem:[%s3941_s1 + $0x40] sm:$0xff] }
 0x3be   : > { %505 = vperm.xlu0 %2715, %v2722_v15  }
 0x3c2   : > { %515 = vperm.xlu0 %2715, %v2724_v16  }
 0x3d3   : > { %911 = vadd.xlane.f32.xlu1 %v910_v28 }
 0x3d7   : > { %1241 = vadd.xlane.f32.xlu1 %v1240_v41 }
 0x3db   : > { %1235 = vadd.xlane.f32.xlu1 %v1234_v39 }
 0x3e1   : > { %1238 = vadd.xlane.f32.xlu0 %v1237_v53 }
 0x423   : > { %v921_v54 = vpop.xlane.xlu1 %920 }
 0x427   : > { %v511_v55 = vpop.permute.xlu1 %510 }
 0x428   : > { %v526_v8 = vmul.f32 %v511_v55, %v3241_v43  ;;  %v525_v9 = vmul.f32 %v511_v55, %v3238_v42  ;;  %v3428_v42 = vld [vmem:[%s3941_s1 + $0x48] sm:$0xff] }
 0x429   : > { %v915_v56 = vpop.xlane.xlu0 %914 }
 0x42a   : > { %v923_v43 = vmul.f32 0.00390625, %v915_v56 }
 0x42b   : > { %v521_v57 = vpop.permute.xlu1 %520 }
 0x42c   : > { %v529_v58 = vmul.f32 %v521_v57, %v3248_v47  ;;  %v530_v63 = vmul.f32 %v521_v57, %v3251_v48 }
 0x42d   : > { %v918_v0 = vpop.xlane.xlu0 %917 }
 0x42e   : > { %587 = vmatprep.subr.mxu1 %v530_v63 }
 0x42f   : > { %588 = vmatpush1.msra.mxu1 %v529_v58 }
 0x431   : > { %v1245_v5 = vpop.xlane.xlu0 %1244 }
 0x432   : > { %v1249_v14 = vmul.f32 0.00390625, %v1245_v5 }
 0x439   : > { %v506_v29 = vpop.permute.xlu0 %505 }
 0x43a   : > { %v524_v47 = vmul.f32 %v506_v29, %v3271_v60  ;;  %v523_v48 = vmul.f32 %v506_v29, %v3268_v59  ;;  %v3436_v59 = vld [vmem:[%s3941_s1 + $0x50] sm:$0xff]  ;;  %v3444_v60 = vld [vmem:[%s3941_s1 + $0x58] sm:$0xff] }
 0x43d   : > { %v516_v30 = vpop.permute.xlu0 %515 }
 0x43e   : > { %v527_v35 = vmul.f32 %v516_v30, %v3254_v51  ;;  %v528_v7 = vmul.f32 %v516_v30, %v3257_v52  ;;  %v925_v51 = vmul.f32 0.00390625, %v921_v54  ;;  %v924_v52 = vmul.f32 0.00390625, %v918_v0 }
 0x440   : > { %589 = vmatprep.subr.mxu1 %v528_v7 }
 0x441   : > { %590 = vmatpush1.msra.mxu1 %v527_v35 }
 0x442   : > { %591 = vmatprep.subr.mxu1 %v526_v8 }
 0x443   : > { %592 = vmatpush1.msra.mxu1 %v525_v9 }
 0x444   : > { %593 = vmatprep.subr.mxu1 %v524_v47 }
 0x445   : > { %594 = vmatpush1.msra.mxu1 %v523_v48 }
 0x446   : > { %2573 = vmatprep.subr.mxu1 %v925_v51  ;;  %2297 = vmatmul.mubr.msk.f32.vlgmr.msra.gmra.mxu1 %vm232_vm0, %v3420_v10 }
 0x447   : > { %2574 = vmatpush3.msra.mxu1 %v925_v51  ;;  %633 = vmatprep.mubr.f32.mxu1 %v3011_v18 }
 0x448   : > { %2575 = vmatprep.subr.mxu1 %v924_v52 }
 0x449   : > { %2576 = vmatpush3.msra.mxu1 %v924_v52 }
 0x44a   : > { %2577 = vmatprep.subr.mxu1 %v923_v43  ;;  %2298 = vmatmul.mubr.msk.f32.gmra.mxu1 %vm232_vm0, %v3428_v42 }
 0x44b   : > { %2578 = vmatpush3.msra.mxu1 %v923_v43  ;;  %639 = vmatprep.mubr.f32.mxu1 %v3011_v18 }
 0x44e   : > { %2299 = vmatmul.mubr.msk.f32.gmra.mxu1 %vm232_vm0, %v3436_v59 }
 0x44f   : > { %645 = vmatprep.mubr.f32.mxu1 %v3011_v18 }
 0x452   : > { %2300 = vmatmul.mubr.msk.f32.gmra.mxu1 %vm232_vm0, %v3444_v60 }
 0x453   : > { %2581 = vmatprep.mubr.msk.f32.mxu1 %vm232_vm0, %v3178_v12 }
 0x45c   : > { %v912_v11 = vpop.xlane.xlu1 %911 }
 0x45d   : > { %v922_v13 = vmul.f32 0.00390625, %v912_v11 }
 0x45f   : > { %2579 = vmatprep.subr.mxu1 %v922_v13 }
 0x460   : > { %2580 = vmatpush3.msra.mxu1 %v922_v13  ;;  %v1242_v15 = vpop.xlane.xlu1 %1241 }
 0x461   : > { %2587 = vmatprep.subr.mxu1 %v1249_v14  ;;  %2582 = vmatmul.mubr.msk.f32.vlgmr.msra.gmra.mxu1 %vm232_vm0, %v3185_v22  ;;  %v1248_v16 = vmul.f32 0.00390625, %v1242_v15 }
 0x462   : > { %2588 = vmatpush3.msra.mxu1 %v1249_v14  ;;  %2584 = vmatprep.mubr.msk.f32.mxu1 %vm232_vm0, %v3190_v23 }
 0x463   : > { %2589 = vmatprep.subr.mxu1 %v1248_v16 }
 0x464   : > { %2590 = vmatpush3.msra.mxu1 %v1248_v16  ;;  %v1236_v17 = vpop.xlane.xlu1 %1235 }
 0x465   : > { %2585 = vmatmul.mubr.msk.f32.gmra.mxu1 %vm232_vm0, %v3199_v24  ;;  %v1246_v28 = vmul.f32 0.00390625, %v1236_v17 }
 0x466   : > { %2595 = vmatprep.mubr.msk.f32.mxu1 %vm232_vm0, %v3178_v12 }
 0x46a   : > { %v1239_v21 = vpop.xlane.xlu0 %1238 }
 0x46b   : > { %v1247_v25 = vmul.f32 0.00390625, %v1239_v21 }
 0x46d   : > { %2591 = vmatprep.subr.mxu1 %v1247_v25 }
 0x46e   : > { %2592 = vmatpush3.msra.mxu1 %v1247_v25 }
 0x46f   : > { %2593 = vmatprep.subr.mxu1 %v1246_v28 }
 0x470   : > { %2594 = vmatpush3.msra.mxu1 %v1246_v28 }
 0x471   : > { %2596 = vmatmul.mubr.msk.f32.vlgmr.msra.gmra.mxu1 %vm232_vm0, %v3185_v22 }
 0x472   : > { %2598 = vmatprep.mubr.msk.f32.mxu1 %vm232_vm0, %v3190_v23 }
 0x475   : > { %2599 = vmatmul.mubr.msk.f32.gmra.mxu1 %vm232_vm0, %v3199_v24 }
 0x476   : > { %2601 = vmatprep.mubr.msk.f32.mxu1 %vm232_vm0, %v3280_v1 }
 0x479   : > { %2602 = vmatmul.mubr.msk.f32.gmra.mxu1 %vm232_vm0, %v3287_v2 }
 0x47a   : > { %2604 = vmatprep.mubr.msk.f32.mxu1 %vm232_vm0, %v3294_v3 }
 0x47d   : > { %2605 = vmatmul.mubr.msk.f32.gmra.mxu1 %vm232_vm0, %v3299_v4 }
 0x47e   : > { %1608 = vmatprep.mubr.f32.mxu1 %v3011_v18 }
 0x506   : > { %v3473_v41 = vpop.f32.mrf.mxu1 }
 0x508   : > { %v3475_v39 = vpop.f32.mrf.mxu1 }
 0x50a   : > { %v3477_v53 = vpop.f32.mrf.mxu1 }
 0x50c   : > { %v3479_v54 = vpop.f32.mrf.mxu1 }
 0x50e   : > { %v3481_v55 = vpop.f32.mrf.mxu1 }
 0x510   : > { %v3483_v56 = vpop.f32.mrf.mxu1 }
 0x512   : > { %v3485_v57 = vpop.f32.mrf.mxu1 }
 0x514   : > { %v3487_v58 = vpop.f32.mrf.mxu1 }
 0x521   : > { %v2583_v63 = vpop.f32.mrf.mxu1 }
 0x522   : > { %v998_v35 = vadd.f32 1e-05, %v2583_v63 }
 0x523   : > { %v992_v0 = vpop.f32.mrf.mxu1 }
 0x524   : > { %v993_v29 = vadd.f32 1e-05, %v992_v0 }
 0x525   : > { %v2586_v5 = vpop.f32.mrf.mxu1 }
 0x526   : > { %2725 = vrsqrt.f32 %v993_v29  ;;  %v1008_v9 = vadd.f32 1e-05, %v2586_v5 }
 0x527   : > { %v1002_v30 = vpop.f32.mrf.mxu1  ;;  %2727 = vrsqrt.f32 %v998_v35 }
 0x528   : > { %v1003_v7 = vadd.f32 1e-05, %v1002_v30 }
 0x52a   : > { %2729 = vrsqrt.f32 %v1003_v7 }
 0x52b   : > { %2731 = vrsqrt.f32 %v1008_v9  ;;  %v3526_v9 = vld [vmem:[%s3137_s11 + $0xe0] sm:$0xff] }
 0x531   : > { %v2597_v8 = vpop.f32.mrf.mxu1 }
 0x533   : > { %v1316_v47 = vpop.f32.mrf.mxu1  ;;  %v2726_v52 = vpop.eup %2725 }
 0x534   : > { %v2728_v43 = vpop.eup %2727 }
 0x535   : > { %v2600_v48 = vpop.f32.mrf.mxu1 }
 0x536   : > { %1372 = vperm.xlu0 %2715, %v2600_v48  }
 0x537   : > { %v1326_v51 = vpop.f32.mrf.mxu1  ;;  %v2730_v11 = vpop.eup %2729 }
 0x538   : > { %1367 = vperm.xlu1 %2716, %v1326_v51   ;;  %v2732_v13 = vpop.eup %2731 }
 0x53a   : > { %1357 = vperm.xlu0 %2715, %v1316_v47   ;;  %v3529_v47 = vld [vmem:[%s3137_s11 + $0xe8] sm:$0xff] }
 0x53c   : > { %1362 = vperm.xlu1 %2716, %v2597_v8  }
 0x53e   : > { %1017 = vperm.xlu0 %2715, %v2726_v52   ;;  %v3536_v52 = vld [vmem:[%s3137_s11 + $0xf0] sm:$0xff] }
 0x540   : > { %1022 = vperm.xlu1 %2716, %v2728_v43   ;;  %v3539_v43 = vld [vmem:[%s3137_s11 + $0xf8] sm:$0xff] }
 0x542   : > { %1027 = vperm.xlu0 %2715, %v2730_v11   ;;  %v1721_v11 = vadd.f32 %v3529_v47, %v3526_v9 }
 0x544   : > { %1032 = vperm.xlu1 %2716, %v2732_v13  }
 0x5b1   : > { %v1373_v14 = vpop.permute.xlu0 %1372 }
 0x5b2   : > { %v3490_v15 = vsub.f32 %v3366_v36, %v1373_v14  ;;  %v3493_v16 = vsub.f32 %v3369_v6, %v1373_v14  ;;  %v3544_v14 = vld [vmem:[%s3137_s11 + $0xc0] sm:$0xff] }
 0x5b3   : > { %v1368_v17 = vpop.permute.xlu1 %1367 }
 0x5b4   : > { %v3496_v21 = vsub.f32 %v3386_v26, %v1368_v17  ;;  %v3499_v25 = vsub.f32 %v3389_v27, %v1368_v17  ;;  %v1389_v28 = vmul.f32 %v3490_v15, %v3490_v15  ;;  %v1390_v63 = vmul.f32 %v3493_v16, %v3493_v16  ;;  %v3547_v17 = vld [vmem:[%s3137_s11 + $0xc8] sm:$0xff] }
 0x5b5   : > { %v1358_v36 = vpop.permute.xlu0 %1357 }
 0x5b6   : > { %v3506_v0 = vsub.f32 %v3394_v38, %v1358_v36  ;;  %v3509_v6 = vsub.f32 %v3397_v44, %v1358_v36  ;;  %v1400_v26 = vadd.f32 %v1390_v63, %v1389_v28  ;;  %v1387_v27 = vmul.f32 %v3496_v21, %v3496_v21 }
 0x5b7   : > { %v1363_v5 = vpop.permute.xlu1 %1362  ;;  %v1388_v29 = vmul.f32 %v3499_v25, %v3499_v25  ;;  %v1724_v36 = vadd.f32 %v3539_v43, %v3536_v52 }
 0x5b8   : > { %v3516_v30 = vsub.f32 %v3402_v49, %v1363_v5  ;;  %v3519_v35 = vsub.f32 %v3405_v50, %v1363_v5  ;;  %1401 = vadd.xlane.f32.xlu1 %v1400_v26  ;;  %v1383_v38 = vmul.f32 %v3506_v0, %v3506_v0  ;;  %v1384_v44 = vmul.f32 %v3509_v6, %v3509_v6  ;;  %v3554_v5 = vld [vmem:[%s3137_s11 + $0xd0] sm:$0xff] }
 0x5b9   : > { %v1018_v7 = vpop.permute.xlu0 %1017  ;;  %v1397_v8 = vadd.f32 %v1388_v29, %v1387_v27  ;;  %v3557_v29 = vld [vmem:[%s3137_s11 + $0xd8] sm:$0xff] }
 0x5ba   : > { %v1391_v49 = vadd.f32 %v1384_v44, %v1383_v38  ;;  %v1385_v50 = vmul.f32 %v3516_v30, %v3516_v30  ;;  %v1386_v51 = vmul.f32 %v3519_v35, %v3519_v35  ;;  %v1715_v38 = vadd.f32 %v3547_v17, %v3544_v14 }
 0x5bb   : > { %1398 = vadd.xlane.f32.xlu0 %v1397_v8  ;;  %v1023_v48 = vpop.permute.xlu1 %1022 }
 0x5bc   : > { %1392 = vadd.xlane.f32.xlu1 %v1391_v49  ;;  %v1394_v13 = vadd.f32 %v1386_v51, %v1385_v50  ;;  %v1037_v49 = vmul.f32 %v1023_v48, %v3352_v61  ;;  %v1036_v50 = vmul.f32 %v1018_v7, %v3379_v20 }
 0x5bd   : > { %v1028_v28 = vpop.permute.xlu0 %1027 }
 0x5be   : > { %v1040_v44 = vmul.f32 %v1028_v28, %v3349_v33  ;;  %v1039_v8 = vmul.f32 %v1028_v28, %v3346_v32  ;;  %v1035_v33 = vmul.f32 %v1018_v7, %v3376_v19 }
 0x5bf   : > { %1395 = vadd.xlane.f32.xlu0 %v1394_v13  ;;  %v1033_v63 = vpop.permute.xlu1 %1032 }
 0x5c0   : > { %v1041_v26 = vmul.f32 %v1033_v63, %v3336_v45  ;;  %v1042_v27 = vmul.f32 %v1033_v63, %v3339_v46  ;;  %1722 = vadd.xlane.f32.xlu1 %v1721_v11  ;;  %v1718_v45 = vadd.f32 %v3557_v29, %v3554_v5  ;;  %v1038_v46 = vmul.f32 %v1023_v48, %v3355_v62 }
 0x5c2   : > { %1087 = vmatprep.subr.mxu0 %v1042_v27 }
 0x5c3   : > { %1725 = vadd.xlane.f32.xlu0 %v1724_v36  ;;  %1088 = vmatpush1.msra.mxu0 %v1041_v26 }
 0x5c4   : > { %1089 = vmatprep.subr.mxu0 %v1040_v44  ;;  %1716 = vadd.xlane.f32.xlu1 %v1715_v38 }
 0x5c5   : > { %1090 = vmatpush1.msra.mxu0 %v1039_v8 }
 0x5c6   : > { %1091 = vmatprep.subr.mxu0 %v1038_v46 }
 0x5c7   : > { %1719 = vadd.xlane.f32.xlu0 %v1718_v45  ;;  %1092 = vmatpush1.msra.mxu0 %v1037_v49 }
 0x5c8   : > { %1093 = vmatprep.subr.mxu0 %v1036_v50 }
 0x5c9   : > { %1094 = vmatpush1.msra.mxu0 %v1035_v33 }
 0x5ca   : > { %2329 = vmatmul.mubr.msk.f32.vlgmr.msra.gmra.mxu0 %vm232_vm0, %v3420_v10 }
 0x5cb   : > { %1133 = vmatprep.mubr.f32.mxu0 %v3011_v18 }
 0x5ce   : > { %2330 = vmatmul.mubr.msk.f32.gmra.mxu0 %vm232_vm0, %v3428_v42 }
 0x5cf   : > { %1139 = vmatprep.mubr.f32.mxu0 %v3011_v18 }
 0x5d2   : > { %2331 = vmatmul.mubr.msk.f32.gmra.mxu0 %vm232_vm0, %v3436_v59 }
 0x5d3   : > { %1145 = vmatprep.mubr.f32.mxu0 %v3011_v18 }
 0x5d6   : > { %2332 = vmatmul.mubr.msk.f32.gmra.mxu0 %vm232_vm0, %v3444_v60 }
 0x5d7   : > { %2615 = vmatprep.mubr.msk.f32.mxu0 %vm232_vm0, %v3178_v12 }
 0x641   : > { %v1402_v32 = vpop.xlane.xlu1 %1401 }
 0x642   : > { %v1406_v61 = vmul.f32 0.00390625, %v1402_v32 }
 0x644   : > { %v1399_v62 = vpop.xlane.xlu0 %1398  ;;  %2607 = vmatprep.subr.mxu0 %v1406_v61 }
 0x645   : > { %v1405_v19 = vmul.f32 0.00390625, %v1399_v62  ;;  %2608 = vmatpush3.msra.mxu0 %v1406_v61  ;;  %v1393_v20 = vpop.xlane.xlu1 %1392 }
 0x646   : > { %v1403_v11 = vmul.f32 0.00390625, %v1393_v20 }
 0x647   : > { %2609 = vmatprep.subr.mxu0 %v1405_v19 }
 0x648   : > { %v1396_v7 = vpop.xlane.xlu0 %1395  ;;  %2610 = vmatpush3.msra.mxu0 %v1405_v19 }
 0x649   : > { %v1404_v48 = vmul.f32 0.00390625, %v1396_v7  ;;  %v1723_v51 = vpop.xlane.xlu1 %1722 }
 0x64a   : > { %v1729_v63 = vmul.f32 0.00390625, %v1723_v51 }
 0x64b   : > { %2611 = vmatprep.subr.mxu0 %v1404_v48 }
 0x64c   : > { %v1726_v13 = vpop.xlane.xlu0 %1725  ;;  %2612 = vmatpush3.msra.mxu0 %v1404_v48 }
 0x64d   : > { %v1730_v28 = vmul.f32 0.00390625, %v1726_v13  ;;  %2613 = vmatprep.subr.mxu0 %v1403_v11  ;;  %v1717_v36 = vpop.xlane.xlu1 %1716 }
 0x64e   : > { %2614 = vmatpush3.msra.mxu0 %v1403_v11  ;;  %v1727_v38 = vmul.f32 0.00390625, %v1717_v36 }
 0x64f   : > { %2616 = vmatmul.mubr.msk.f32.vlgmr.msra.gmra.mxu0 %vm232_vm0, %v3185_v22  ;;  %2621 = vmatprep.subr.mxu0 %v1730_v28 }
 0x650   : > { %v1720_v26 = vpop.xlane.xlu0 %1719  ;;  %2622 = vmatpush3.msra.mxu0 %v1730_v28  ;;  %2618 = vmatprep.mubr.msk.f32.mxu0 %vm232_vm0, %v3190_v23 }
 0x651   : > { %v1728_v27 = vmul.f32 0.00390625, %v1720_v26  ;;  %2623 = vmatprep.subr.mxu0 %v1729_v63 }
 0x652   : > { %2624 = vmatpush3.msra.mxu0 %v1729_v63 }
 0x653   : > { %2619 = vmatmul.mubr.msk.f32.gmra.mxu0 %vm232_vm0, %v3199_v24  ;;  %2625 = vmatprep.subr.mxu0 %v1728_v27 }
 0x654   : > { %2626 = vmatpush3.msra.mxu0 %v1728_v27  ;;  %2629 = vmatprep.mubr.msk.f32.mxu0 %vm232_vm0, %v3178_v12  ;;  %v3605_v12 = vpop.f32.mrf.mxu0 }
 0x655   : > { %2627 = vmatprep.subr.mxu0 %v1727_v38 }
 0x656   : > { %2628 = vmatpush3.msra.mxu0 %v1727_v38 }
 0x657   : > { %2630 = vmatmul.mubr.msk.f32.vlgmr.msra.gmra.mxu0 %vm232_vm0, %v3185_v22  ;;  %v3607_v22 = vpop.f32.mrf.mxu0 }
 0x658   : > { %2632 = vmatprep.mubr.msk.f32.mxu0 %vm232_vm0, %v3190_v23 }
 0x659   : > { %v3609_v23 = vpop.f32.mrf.mxu0 }
 0x65b   : > { %2633 = vmatmul.mubr.msk.f32.gmra.mxu0 %vm232_vm0, %v3199_v24  ;;  %v3611_v24 = vpop.f32.mrf.mxu0 }
 0x65c   : > { %2635 = vmatprep.mubr.msk.f32.mxu0 %vm232_vm0, %v3280_v1 }
 0x65f   : > { %2636 = vmatmul.mubr.msk.f32.gmra.mxu0 %vm232_vm0, %v3287_v2 }
 0x660   : > { %2638 = vmatprep.mubr.msk.f32.mxu0 %vm232_vm0, %v3294_v3 }
 0x663   : > { %2639 = vmatmul.mubr.msk.f32.gmra.mxu0 %vm232_vm0, %v3299_v4 }
 0x664   : > { %2089 = vmatprep.mubr.f32.mxu0 %v3011_v18 }
 0x68a   : > { %v3613_v1 = vpop.f32.mrf.mxu0 }
 0x68c   : > { %v3615_v44 = vpop.f32.mrf.mxu0 }
 0x68e   : > { %v3617_v2 = vpop.f32.mrf.mxu0 }
 0x690   : > { %v3619_v3 = vpop.f32.mrf.mxu0 }
 0x692   : > { %v3621_v8 = vpop.f32.mrf.mxu0 }
 0x694   : > { %v3623_v4 = vpop.f32.mrf.mxu0 }
 0x696   : > { %v3625_v45 = vpop.f32.mrf.mxu0 }
 0x698   : > { %v3627_v46 = vpop.f32.mrf.mxu0 }
 0x70f   : > { %v2617_v49 = vpop.f32.mrf.mxu0 }
 0x710   : > { %v1479_v61 = vadd.f32 1e-05, %v2617_v49 }
 0x711   : > { %v1473_v50 = vpop.f32.mrf.mxu0 }
 0x712   : > { %v1474_v33 = vadd.f32 1e-05, %v1473_v50 }
 0x713   : > { %v2620_v32 = vpop.f32.mrf.mxu0 }
 0x714   : > { %2733 = vrsqrt.f32 %v1474_v33  ;;  %v1489_v7 = vadd.f32 1e-05, %v2620_v32 }
 0x715   : > { %v1483_v62 = vpop.f32.mrf.mxu0  ;;  %2735 = vrsqrt.f32 %v1479_v61 }
 0x716   : > { %v1484_v19 = vadd.f32 1e-05, %v1483_v62 }
 0x717   : > { %v2631_v20 = vpop.f32.mrf.mxu0 }
 0x718   : > { %2737 = vrsqrt.f32 %v1484_v19 }
 0x719   : > { %v1797_v48 = vpop.f32.mrf.mxu0  ;;  %2739 = vrsqrt.f32 %v1489_v7 }
 0x71b   : > { %v2634_v51 = vpop.f32.mrf.mxu0 }
 0x71c   : > { %1853 = vperm.xlu0 %2715, %v2634_v51  }
 0x71d   : > { %v1807_v11 = vpop.f32.mrf.mxu0 }
 0x71e   : > { %1848 = vperm.xlu1 %2716, %v1807_v11  }
 0x720   : > { %1838 = vperm.xlu0 %2715, %v1797_v48  }
 0x721   : > { %v2734_v13 = vpop.eup %2733 }
 0x722   : > { %1843 = vperm.xlu1 %2716, %v2631_v20   ;;  %v2736_v28 = vpop.eup %2735 }
 0x724   : > { %1498 = vperm.xlu0 %2715, %v2734_v13  }
 0x725   : > { %v2738_v63 = vpop.eup %2737 }
 0x726   : > { %1503 = vperm.xlu1 %2716, %v2736_v28   ;;  %v2740_v36 = vpop.eup %2739 }
 0x728   : > { %1508 = vperm.xlu0 %2715, %v2738_v63  }
 0x72a   : > { %1513 = vperm.xlu1 %2716, %v2740_v36  }
 0x797   : > { %v1854_v26 = vpop.permute.xlu0 %1853 }
 0x798   : > { %v3630_v27 = vsub.f32 %v3536_v52, %v1854_v26  ;;  %v3633_v38 = vsub.f32 %v3539_v43, %v1854_v26 }
 0x799   : > { %v1849_v49 = vpop.permute.xlu1 %1848 }
 0x79a   : > { %v3636_v50 = vsub.f32 %v3526_v9, %v1849_v49  ;;  %v3639_v33 = vsub.f32 %v3529_v47, %v1849_v49  ;;  %v1870_v32 = vmul.f32 %v3630_v27, %v3630_v27  ;;  %v1871_v61 = vmul.f32 %v3633_v38, %v3633_v38 }
 0x79b   : > { %v1839_v62 = vpop.permute.xlu0 %1838 }
 0x79c   : > { %v3646_v52 = vsub.f32 %v3544_v14, %v1839_v62  ;;  %v3649_v43 = vsub.f32 %v3547_v17, %v1839_v62  ;;  %v1881_v19 = vadd.f32 %v1871_v61, %v1870_v32  ;;  %v1868_v9 = vmul.f32 %v3636_v50, %v3636_v50 }
 0x79d   : > { %v1844_v20 = vpop.permute.xlu1 %1843  ;;  %v1869_v47 = vmul.f32 %v3639_v33, %v3639_v33 }
 0x79e   : > { %v3656_v7 = vsub.f32 %v3554_v5, %v1844_v20  ;;  %v3659_v48 = vsub.f32 %v3557_v29, %v1844_v20  ;;  %1882 = vadd.xlane.f32.xlu1 %v1881_v19  ;;  %v1864_v14 = vmul.f32 %v3646_v52, %v3646_v52  ;;  %v1865_v17 = vmul.f32 %v3649_v43, %v3649_v43 }
 0x79f   : > { %v1499_v51 = vpop.permute.xlu0 %1498  ;;  %v1878_v11 = vadd.f32 %v1869_v47, %v1868_v9 }
 0x7a0   : > { %v1872_v13 = vadd.f32 %v1865_v17, %v1864_v14  ;;  %v1866_v28 = vmul.f32 %v3656_v7, %v3656_v7  ;;  %v1867_v5 = vmul.f32 %v3659_v48, %v3659_v48  ;;  %v1517_v20 = vmul.f32 %v1499_v51, %v3509_v6  ;;  %v2878_v17 = vld [vmem:[%s3941_s1 + $0x8] sm:$0xff] }
 0x7a1   : > { %1879 = vadd.xlane.f32.xlu0 %v1878_v11  ;;  %v1504_v63 = vpop.permute.xlu1 %1503  ;;  %v1516_v47 = vmul.f32 %v1499_v51, %v3506_v0  ;;  %v2879_v51 = vld [vmem:[%s3941_s1 + $0x10] sm:$0xff]  ;;  %v2880_v11 = vld [vmem:[%s3941_s1 + $0x18] sm:$0xff] }
 0x7a2   : > { %1873 = vadd.xlane.f32.xlu1 %v1872_v13  ;;  %v1875_v29 = vadd.f32 %v1867_v5, %v1866_v28  ;;  %v1519_v19 = vmul.f32 %v1504_v63, %v3519_v35  ;;  %v1518_v9 = vmul.f32 %v1504_v63, %v3516_v30  ;;  %v2603_v13 = vpop.f32.mrf.mxu1 }
 0x7a3   : > { %v1509_v36 = vpop.permute.xlu0 %1508 }
 0x7a4   : > { %v1521_v61 = vmul.f32 %v1509_v36, %v3499_v25  ;;  %v1520_v62 = vmul.f32 %v1509_v36, %v3496_v21  ;;  %v1336_v28 = vpop.f32.mrf.mxu1 }
 0x7a5   : > { %1876 = vadd.xlane.f32.xlu0 %v1875_v29  ;;  %v1514_v26 = vpop.permute.xlu1 %1513 }
 0x7a6   : > { %v1522_v49 = vmul.f32 %v1514_v26, %v3490_v15  ;;  %v1523_v32 = vmul.f32 %v1514_v26, %v3493_v16  ;;  %v2877_v15 = vld [vmem:[%s3941_s1] sm:$0xff]  ;;  %v2606_v63 = vpop.f32.mrf.mxu1 }
 0x7a8   : > { %1568 = vmatprep.subr.mxu1 %v1523_v32  ;;  %v1346_v5 = vpop.f32.mrf.mxu1 }
 0x7a9   : > { %1569 = vmatpush1.msra.mxu1 %v1522_v49 }
 0x7aa   : > { %1570 = vmatprep.subr.mxu1 %v1521_v61 }
 0x7ab   : > { %1571 = vmatpush1.msra.mxu1 %v1520_v62 }
 0x7ac   : > { %1572 = vmatprep.subr.mxu1 %v1519_v19 }
 0x7ad   : > { %1573 = vmatpush1.msra.mxu1 %v1518_v9 }
 0x7ae   : > { %1574 = vmatprep.subr.mxu1 %v1517_v20 }
 0x7af   : > { %1575 = vmatpush1.msra.mxu1 %v1516_v47 }
 0x7b0   : > { %2369 = vmatmul.mubr.msk.f32.vlgmr.msra.gmra.mxu1 %vm232_vm0, %v3420_v10 }
 0x7b1   : > { %1614 = vmatprep.mubr.f32.mxu1 %v3011_v18 }
 0x7b4   : > { %2370 = vmatmul.mubr.msk.f32.gmra.mxu1 %vm232_vm0, %v3428_v42 }
 0x7b5   : > { %1620 = vmatprep.mubr.f32.mxu1 %v3011_v18 }
 0x7b8   : > { %2371 = vmatmul.mubr.msk.f32.gmra.mxu1 %vm232_vm0, %v3436_v59 }
 0x7b9   : > { %1626 = vmatprep.mubr.f32.mxu1 %v3011_v18 }
 0x7bc   : > { %2372 = vmatmul.mubr.msk.f32.gmra.mxu1 %vm232_vm0, %v3444_v60 }
 0x7bd   : > { %2649 = vmatprep.mubr.msk.f32.mxu1 %vm232_vm0, %v2877_v15 }
 0x827   : > { %v1883_v16 = vpop.xlane.xlu1 %1882 }
 0x828   : > { %v1887_v21 = vmul.f32 0.00390625, %v1883_v16 }
 0x82a   : > { %v1880_v25 = vpop.xlane.xlu0 %1879  ;;  %2641 = vmatprep.subr.mxu1 %v1887_v21 }
 0x82b   : > { %v1886_v0 = vmul.f32 0.00390625, %v1880_v25  ;;  %2642 = vmatpush3.msra.mxu1 %v1887_v21  ;;  %v1874_v6 = vpop.xlane.xlu1 %1873 }
 0x82c   : > { %v1884_v14 = vmul.f32 0.00390625, %v1874_v6 }
 0x82d   : > { %2643 = vmatprep.subr.mxu1 %v1886_v0 }
 0x82e   : > { %v1877_v30 = vpop.xlane.xlu0 %1876  ;;  %2644 = vmatpush3.msra.mxu1 %v1886_v0 }
 0x82f   : > { %v1885_v35 = vmul.f32 0.00390625, %v1877_v30 }
 0x831   : > { %2645 = vmatprep.subr.mxu1 %v1885_v35 }
 0x832   : > { %2646 = vmatpush3.msra.mxu1 %v1885_v35 }
 0x833   : > { %2647 = vmatprep.subr.mxu1 %v1884_v14 }
 0x834   : > { %2648 = vmatpush3.msra.mxu1 %v1884_v14 }
 0x835   : > { %2650 = vmatmul.mubr.msk.f32.vlgmr.msra.gmra.mxu1 %vm232_vm0, %v2878_v17  ;;  %v205_v17 = vld [vmem:[%s3942_s2 + $0x8] sm:$0xff] }
 0x836   : > { %2652 = vmatprep.mubr.msk.f32.mxu1 %vm232_vm0, %v2879_v51  ;;  %v204_v51 = vld [vmem:[%s3942_s2] sm:$0xff] }
 0x839   : > { %2653 = vmatmul.mubr.msk.f32.gmra.mxu1 %vm232_vm0, %v2880_v11  ;;  %v207_v11 = vld [vmem:[%s3942_s2 + $0x18] sm:$0xff] }
 0x870   : > { %v3704_v29 = vpop.f32.mrf.mxu1 }
 0x872   : > { %v3706_v36 = vpop.f32.mrf.mxu1 }
 0x874   : > { %v3708_v26 = vpop.f32.mrf.mxu1 }
 0x876   : > { %v3710_v49 = vpop.f32.mrf.mxu1 }
 0x878   : > { %v3712_v32 = vpop.f32.mrf.mxu1 }
 0x87a   : > { %v3714_v61 = vpop.f32.mrf.mxu1 }
 0x87c   : > { %v3716_v62 = vpop.f32.mrf.mxu1 }
 0x87e   : > { %v3718_v19 = vpop.f32.mrf.mxu1 }
 0x8f5   : > { %v2651_v9 = vpop.f32.mrf.mxu1 }
 0x8f6   : > { %v1960_v0 = vadd.f32 1e-05, %v2651_v9 }
 0x8f7   : > { %v1954_v20 = vpop.f32.mrf.mxu1 }
 0x8f8   : > { %v1955_v21 = vadd.f32 1e-05, %v1954_v20 }
 0x8f9   : > { %v2654_v47 = vpop.f32.mrf.mxu1 }
 0x8fa   : > { %v1970_v15 = vadd.f32 1e-05, %v2654_v47 }
 0x8fb   : > { %v1964_v16 = vpop.f32.mrf.mxu1 }
 0x8fc   : > { %2741 = vrsqrt.f32 %v1970_v15  ;;  %v1965_v25 = vadd.f32 1e-05, %v1964_v16 }
 0x8fe   : > { %2743 = vrsqrt.f32 %v1965_v25 }
 0x8ff   : > { %2745 = vrsqrt.f32 %v1955_v21 }
 0x900   : > { %2747 = vrsqrt.f32 %v1960_v0 }
 0x909   : > { %v2742_v6 = vpop.eup %2741 }
 0x90a   : > { %1994 = vperm.xlu0 %2715, %v2742_v6  }
 0x90b   : > { %v2744_v30 = vpop.eup %2743 }
 0x90c   : > { %1989 = vperm.xlu1 %2716, %v2744_v30   ;;  %v2746_v35 = vpop.eup %2745 }
 0x90d   : > { %v2748_v14 = vpop.eup %2747 }
 0x90e   : > { %1979 = vperm.xlu0 %2715, %v2746_v35  }
 0x910   : > { %1984 = vperm.xlu1 %2716, %v2748_v14  }
 0x912   : > { %538 = vperm.xlu0 %2715, %v3327_v31   ;;  %v206_v31 = vld [vmem:[%s3942_s2 + $0x10] sm:$0xff] }
 0x914   : > { %533 = vperm.xlu1 %2716, %v3329_v34   ;;  %v2637_v34 = vpop.f32.mrf.mxu0 }
 0x916   : > { %548 = vperm.xlu0 %2715, %v3331_v37   ;;  %v1817_v37 = vpop.f32.mrf.mxu0 }
 0x918   : > { %543 = vperm.xlu1 %2716, %v3333_v40   ;;  %v2640_v40 = vpop.f32.mrf.mxu0 }
 0x91a   : > { %659 = vperm.xlu0 %2715, %v205_v17   ;;  %v1827_v9 = vpop.f32.mrf.mxu0 }
 0x91c   : > { %654 = vperm.xlu1 %2716, %v204_v51  }
 0x91e   : > { %669 = vperm.xlu0 %2715, %v207_v11  }
 0x920   : > { %664 = vperm.xlu1 %2716, %v206_v31  }
 0x922   : > { %1050 = vperm.xlu0 %2715, %v3605_v12  }
 0x924   : > { %1045 = vperm.xlu1 %2716, %v3607_v22  }
 0x926   : > { %1060 = vperm.xlu0 %2715, %v3609_v23  }
 0x928   : > { %1055 = vperm.xlu1 %2716, %v3611_v24  }
 0x92a   : > { %1531 = vperm.xlu0 %2715, %v2603_v13  }
 0x92c   : > { %1526 = vperm.xlu1 %2716, %v1336_v28  }
 0x92e   : > { %1541 = vperm.xlu0 %2715, %v2606_v63  }
 0x930   : > { %1536 = vperm.xlu1 %2716, %v1346_v5  }
 0x932   : > { %2012 = vperm.xlu0 %2715, %v2637_v34  }
 0x934   : > { %2007 = vperm.xlu1 %2716, %v1817_v37  }
 0x936   : > { %2022 = vperm.xlu0 %2715, %v2640_v40  }
 0x938   : > { %2017 = vperm.xlu1 %2716, %v1827_v9  }
 0x985   : > { %v1995_v20 = vpop.permute.xlu0 %1994 }
 0x986   : > { %v2003_v12 = vmul.f32 %v1995_v20, %v3630_v27  ;;  %v2004_v22 = vmul.f32 %v1995_v20, %v3633_v38 }
 0x987   : > { %v1990_v23 = vpop.permute.xlu1 %1989 }
 0x988   : > { %v2001_v24 = vmul.f32 %v1990_v23, %v3636_v50  ;;  %v2002_v13 = vmul.f32 %v1990_v23, %v3639_v33  ;;  %2049 = vmatprep.subr.mxu0 %v2004_v22 }
 0x989   : > { %2050 = vmatpush1.msra.mxu0 %v2003_v12  ;;  %v1980_v28 = vpop.permute.xlu0 %1979 }
 0x98a   : > { %2051 = vmatprep.subr.mxu0 %v2002_v13  ;;  %v1998_v27 = vmul.f32 %v1980_v28, %v3649_v43  ;;  %v1997_v38 = vmul.f32 %v1980_v28, %v3646_v52 }
 0x98b   : > { %2052 = vmatpush1.msra.mxu0 %v2001_v24  ;;  %v1985_v63 = vpop.permute.xlu1 %1984 }
 0x98c   : > { %v1999_v5 = vmul.f32 %v1985_v63, %v3656_v7  ;;  %v2000_v47 = vmul.f32 %v1985_v63, %v3659_v48 }
 0x98d   : > { %v539_v15 = vpop.permute.xlu0 %538 }
 0x98e   : > { %2053 = vmatprep.subr.mxu0 %v2000_v47  ;;  %v636_v7 = vadd.f32 %v3477_v53, %v539_v15  ;;  %v638_v48 = vadd.f32 %v3479_v54, %v539_v15 }
 0x98f   : > { %2054 = vmatpush1.msra.mxu0 %v1999_v5  ;;  %v534_v50 = vpop.permute.xlu1 %533 }
 0x990   : > { %2055 = vmatprep.subr.mxu0 %v1998_v27  ;;  %v630_v43 = vadd.f32 %v3473_v41, %v534_v50  ;;  %v632_v52 = vadd.f32 %v3475_v39, %v534_v50 }
 0x991   : > { %2056 = vmatpush1.msra.mxu0 %v1997_v38  ;;  %v549_v33 = vpop.permute.xlu0 %548 }
 0x992   : > { %2409 = vmatmul.mubr.msk.f32.vlgmr.msra.gmra.mxu0 %vm232_vm0, %v3420_v10  ;;  %v648_v10 = vadd.f32 %v3485_v57, %v549_v33  ;;  %v650_v39 = vadd.f32 %v3487_v58, %v549_v33 }
 0x993   : > { %v544_v16 = vpop.permute.xlu1 %543  ;;  %2095 = vmatprep.mubr.f32.mxu0 %v3011_v18 }
 0x994   : > { %v642_v35 = vadd.f32 %v3481_v55, %v544_v16  ;;  %v644_v14 = vadd.f32 %v3483_v56, %v544_v16 }
 0x995   : > { %v3753_v21 = vpop.permute.xlu0 %659 }
 0x996   : > { %v674_v25 = vadd.f32 %v3753_v21, %v636_v7  ;;  %v675_v0 = vadd.f32 %v3753_v21, %v638_v48  ;;  %2410 = vmatmul.mubr.msk.f32.gmra.mxu0 %vm232_vm0, %v3428_v42 }
 0x997   : > { %v3762_v6 = vpop.permute.xlu1 %654  ;;  %2101 = vmatprep.mubr.f32.mxu0 %v3011_v18 }
 0x998   : > { %v2303_v53 = vmul.f32 -1.442695, %v674_v25  ;;  %v2304_v54 = vmul.f32 -1.442695, %v675_v0  ;;  %v672_v30 = vadd.f32 %v3762_v6, %v630_v43  ;;  %v673_v41 = vadd.f32 %v3762_v6, %v632_v52 }
 0x999   : > { %v3770_v17 = vpop.permute.xlu0 %669 }
 0x99a   : > { %2749 = vpow2.f32 %v2303_v53  ;;  %v2301_v42 = vmul.f32 -1.442695, %v672_v30  ;;  %v2302_v57 = vmul.f32 -1.442695, %v673_v41  ;;  %v678_v51 = vadd.f32 %v3770_v17, %v648_v10  ;;  %2411 = vmatmul.mubr.msk.f32.gmra.mxu0 %vm232_vm0, %v3436_v59 }
 0x99b   : > { %2751 = vpow2.f32 %v2304_v54  ;;  %v679_v11 = vadd.f32 %v3770_v17, %v650_v39  ;;  %v3776_v31 = vpop.permute.xlu1 %664  ;;  %2107 = vmatprep.mubr.f32.mxu0 %v3011_v18 }
 0x99c   : > { %2753 = vpow2.f32 %v2301_v42  ;;  %v2307_v55 = vmul.f32 -1.442695, %v678_v51  ;;  %v676_v56 = vadd.f32 %v3776_v31, %v642_v35  ;;  %v677_v58 = vadd.f32 %v3776_v31, %v644_v14 }
 0x99d   : > { %2755 = vpow2.f32 %v2302_v57  ;;  %v2308_v34 = vmul.f32 -1.442695, %v679_v11  ;;  %v1051_v37 = vpop.permute.xlu0 %1050 }
 0x99e   : > { %2757 = vpow2.f32 %v2307_v55  ;;  %v2305_v40 = vmul.f32 -1.442695, %v676_v56  ;;  %v2306_v9 = vmul.f32 -1.442695, %v677_v58  ;;  %v1136_v59 = vadd.f32 %v3617_v2, %v1051_v37  ;;  %2412 = vmatmul.mubr.msk.f32.gmra.mxu0 %vm232_vm0, %v3444_v60 }
 0x99f   : > { %2759 = vpow2.f32 %v2308_v34  ;;  %v1138_v18 = vadd.f32 %v3619_v3, %v1051_v37  ;;  %v1046_v20 = vpop.permute.xlu1 %1045 }
 0x9a0   : > { %2761 = vpow2.f32 %v2305_v40  ;;  %v1154_v12 = vadd.f32 %v1136_v59, %v3753_v21  ;;  %v1130_v22 = vadd.f32 %v3613_v1, %v1046_v20  ;;  %v1132_v23 = vadd.f32 %v3615_v44, %v1046_v20 }
 0x9a1   : > { %2763 = vpow2.f32 %v2306_v9  ;;  %v1155_v24 = vadd.f32 %v1138_v18, %v3753_v21  ;;  %v1061_v13 = vpop.permute.xlu0 %1060 }
 0x9a2   : > { %v2335_v28 = vmul.f32 -1.442695, %v1154_v12  ;;  %v1152_v2 = vadd.f32 %v1130_v22, %v3762_v6  ;;  %v1153_v60 = vadd.f32 %v1132_v23, %v3762_v6  ;;  %v1148_v63 = vadd.f32 %v3625_v45, %v1061_v13 }
 0x9a3   : > { %v2336_v3 = vmul.f32 -1.442695, %v1155_v24  ;;  %v1150_v5 = vadd.f32 %v3627_v46, %v1061_v13  ;;  %v1056_v47 = vpop.permute.xlu1 %1055 }
 0x9a4   : > { %2765 = vpow2.f32 %v2335_v28  ;;  %v2333_v15 = vmul.f32 -1.442695, %v1152_v2  ;;  %v2334_v1 = vmul.f32 -1.442695, %v1153_v60  ;;  %v1158_v44 = vadd.f32 %v1148_v63, %v3770_v17 }
 0x9a5   : > { %2767 = vpow2.f32 %v2336_v3  ;;  %v1159_v27 = vadd.f32 %v1150_v5, %v3770_v17  ;;  %v1142_v50 = vadd.f32 %v3621_v8, %v1056_v47  ;;  %v1144_v45 = vadd.f32 %v3623_v4, %v1056_v47  ;;  %v1532_v52 = vpop.permute.xlu0 %1531 }
 0x9a6   : > { %2769 = vpow2.f32 %v2333_v15  ;;  %v2339_v38 = vmul.f32 -1.442695, %v1158_v44  ;;  %v1617_v51 = vadd.f32 %v3708_v26, %v1532_v52  ;;  %v1619_v56 = vadd.f32 %v3710_v49, %v1532_v52 }
 0x9a7   : > { %v2750_v33 = vpop.eup %2749  ;;  %2771 = vpow2.f32 %v2334_v1  ;;  %v2340_v16 = vmul.f32 -1.442695, %v1159_v27  ;;  %v1156_v10 = vadd.f32 %v1142_v50, %v3776_v31  ;;  %v1157_v54 = vadd.f32 %v1144_v45, %v3776_v31  ;;  %v1527_v30 = vpop.permute.xlu1 %1526  ;;  %v2881_v27 = vld [vmem:[%s3137_s11 + $0x10] sm:$0xff] }
 0x9a8   : > { %v2752_v7 = vpop.eup %2751  ;;  %v706_v46 = vadd.f32 1.0, %v2750_v33  ;;  %2773 = vpow2.f32 %v2339_v38  ;;  %v1611_v34 = vadd.f32 %v3704_v29, %v1527_v30  ;;  %v1613_v40 = vadd.f32 %v3706_v36, %v1527_v30  ;;  %v2885_v30 = vld [vmem:[%s3137_s11 + $0x30] sm:$0xff] }
 0x9a9   : > { %v2754_v48 = vpop.eup %2753  ;;  %v707_v43 = vadd.f32 1.0, %v2752_v7  ;;  %2775 = vpow2.f32 %v2340_v16  ;;  %v2337_v57 = vmul.f32 -1.442695, %v1156_v10  ;;  %v2338_v55 = vmul.f32 -1.442695, %v1157_v54  ;;  %v1542_v58 = vpop.permute.xlu0 %1541  ;;  %v2882_v16 = vld [vmem:[%s3137_s11 + $0x18] sm:$0xff] }
 0x9aa   : > { %v2756_v25 = vpop.eup %2755  ;;  %2777 = vrcp.f32 %v706_v46  ;;  %v704_v0 = vadd.f32 1.0, %v2754_v48  ;;  %v1635_v20 = vadd.f32 %v1617_v51, %v3753_v21  ;;  %v1629_v26 = vadd.f32 %v3716_v62, %v1542_v58  ;;  %v2884_v10 = vld [vmem:[%s3137_s11 + $0x8] sm:$0xff]  ;;  %v2887_v51 = vld [vmem:[%s3137_s11 + $0x20] sm:$0xff] }
 0x9ab   : > { %v2758_v53 = vpop.eup %2757  ;;  %2779 = vrcp.f32 %v707_v43  ;;  %v705_v8 = vadd.f32 1.0, %v2756_v25  ;;  %v1537_v9 = vpop.permute.xlu1 %1536  ;;  %v1636_v49 = vadd.f32 %v1619_v56, %v3753_v21  ;;  %v1631_v23 = vadd.f32 %v3718_v19, %v1542_v58  ;;  %v2883_v43 = vld [vmem:[%s3137_s11] sm:$0xff]  ;;  %v2888_v56 = vld [vmem:[%s3137_s11 + $0x28] sm:$0xff] }
 0x9ac   : > { %v2760_v41 = vpop.eup %2759  ;;  %2781 = vrcp.f32 %v704_v0  ;;  %v710_v4 = vadd.f32 1.0, %v2758_v53  ;;  %v1633_v36 = vadd.f32 %v1611_v34, %v3762_v6  ;;  %v1623_v13 = vadd.f32 %v3712_v32, %v1537_v9 }
 0x9ad   : > { %v2762_v39 = vpop.eup %2761  ;;  %2783 = vrcp.f32 %v705_v8  ;;  %v711_v35 = vadd.f32 1.0, %v2760_v41  ;;  %v1634_v62 = vadd.f32 %v1613_v40, %v3762_v6  ;;  %v1625_v60 = vadd.f32 %v3714_v61, %v1537_v9 }
 0x9ae   : > { %v2764_v14 = vpop.eup %2763  ;;  %2785 = vrcp.f32 %v710_v4  ;;  %v708_v42 = vadd.f32 1.0, %v2762_v39  ;;  %v2375_v19 = vmul.f32 -1.442695, %v1635_v20  ;;  %v1639_v5 = vadd.f32 %v1629_v26, %v3770_v17 }
 0x9af   : > { %2787 = vrcp.f32 %v711_v35  ;;  %v709_v11 = vadd.f32 1.0, %v2764_v14  ;;  %v2376_v32 = vmul.f32 -1.442695, %v1636_v49  ;;  %v1640_v1 = vadd.f32 %v1631_v23, %v3770_v17  ;;  %v2886_v35 = vld [vmem:[%s3137_s11 + $0x38] sm:$0xff]  ;;  %v2891_v23 = vld [vmem:[%s3137_s11 + $0x40] sm:$0xff] }
 0x9b0   : > { %2789 = vrcp.f32 %v708_v42  ;;  %v2373_v61 = vmul.f32 -1.442695, %v1633_v36  ;;  %v1637_v50 = vadd.f32 %v1623_v13, %v3776_v31  ;;  %v2374_v7 = vmul.f32 -1.442695, %v1634_v62  ;;  %v2892_v36 = vld [vmem:[%s3137_s11 + $0x48] sm:$0xff] }
 0x9b1   : > { %v2766_v37 = vpop.eup %2765  ;;  %2791 = vrcp.f32 %v709_v11  ;;  %v1638_v46 = vadd.f32 %v1625_v60, %v3776_v31  ;;  %v2379_v25 = vmul.f32 -1.442695, %v1639_v5  ;;  %v2380_v8 = vmul.f32 -1.442695, %v1640_v1 }
 0x9b2   : > { %v2768_v59 = vpop.eup %2767  ;;  %v1186_v18 = vadd.f32 1.0, %v2766_v37  ;;  %2793 = vpow2.f32 %v2337_v57  ;;  %v2377_v4 = vmul.f32 -1.442695, %v1637_v50 }
 0x9b3   : > { %v2770_v12 = vpop.eup %2769  ;;  %v1187_v22 = vadd.f32 1.0, %v2768_v59  ;;  %2795 = vpow2.f32 %v2338_v55  ;;  %v2378_v42 = vmul.f32 -1.442695, %v1638_v46 }
 0x9b4   : > { %v2772_v29 = vpop.eup %2771  ;;  %2797 = vrcp.f32 %v1186_v18  ;;  %v1184_v24 = vadd.f32 1.0, %v2770_v12  ;;  %v2889_v18 = vld [vmem:[%s3137_s11 + $0x50] sm:$0xff]  ;;  %v2890_v12 = vld [vmem:[%s3137_s11 + $0x58] sm:$0xff] }
 0x9b5   : > { %v2774_v28 = vpop.eup %2773  ;;  %2799 = vrcp.f32 %v1187_v22  ;;  %v1185_v2 = vadd.f32 1.0, %v2772_v29 }
 0x9b6   : > { %v2776_v63 = vpop.eup %2775  ;;  %2801 = vrcp.f32 %v1184_v24  ;;  %v1190_v3 = vadd.f32 1.0, %v2774_v28 }
 0x9b7   : > { %v2778_v47 = vpop.eup %2777  ;;  %2803 = vrcp.f32 %v1185_v2  ;;  %v1191_v15 = vadd.f32 1.0, %v2776_v63  ;;  %v2893_v2 = vld [vmem:[%s3137_s11 + $0x70] sm:$0xff]  ;;  %v2894_v63 = vld [vmem:[%s3137_s11 + $0x78] sm:$0xff] }
 0x9b8   : > { %v2780_v44 = vpop.eup %2779  ;;  %v730_v38 = vmul.f32 %v2881_v27, %v2778_v47  ;;  %2805 = vrcp.f32 %v1190_v3 }
 0x9b9   : > { %v2782_v33 = vpop.eup %2781  ;;  %v731_v45 = vmul.f32 %v2882_v16, %v2780_v44  ;;  %2807 = vrcp.f32 %v1191_v15 }
 0x9ba   : > { %v2784_v48 = vpop.eup %2783  ;;  %738 = vst [vmem:[%s3819_s27 + $0x10] sm:$0xff] %v730_v38  ;;  %v728_v52 = vmul.f32 %v2883_v43, %v2782_v33  ;;  %2809 = vpow2.f32 %v2375_v19  ;;  %v2895_v43 = vld [vmem:[%s3137_s11 + $0x60] sm:$0xff] }
 0x9bb   : > { %v2786_v0 = vpop.eup %2785  ;;  %739 = vst [vmem:[%s3819_s27 + $0x18] sm:$0xff] %v731_v45  ;;  %v729_v53 = vmul.f32 %v2884_v10, %v2784_v48  ;;  %2811 = vpow2.f32 %v2376_v32 }
 0x9bc   : > { %v2788_v54 = vpop.eup %2787  ;;  %736 = vst [vmem:[%s3819_s27] sm:$0xff] %v728_v52  ;;  %v734_v41 = vmul.f32 %v2885_v30, %v2786_v0  ;;  %2813 = vpow2.f32 %v2373_v61 }
 0x9bd   : > { %v2790_v39 = vpop.eup %2789  ;;  %737 = vst [vmem:[%s3819_s27 + $0x8] sm:$0xff] %v729_v53  ;;  %v735_v14 = vmul.f32 %v2886_v35, %v2788_v54  ;;  %2815 = vpow2.f32 %v2374_v7  ;;  %v2899_v35 = vld [vmem:[%s3137_s11 + $0x80] sm:$0xff] }
 0x9be   : > { %v2792_v57 = vpop.eup %2791  ;;  %742 = vst [vmem:[%s3819_s27 + $0x30] sm:$0xff] %v734_v41  ;;  %v732_v11 = vmul.f32 %v2887_v51, %v2790_v39  ;;  %2817 = vpow2.f32 %v2379_v25  ;;  %v2896_v25 = vld [vmem:[%s3137_s11 + $0x68] sm:$0xff]  ;;  %v2898_v41 = vld [vmem:[%s3137_s11 + $0x98] sm:$0xff] }
 0x9bf   : > { %v2794_v55 = vpop.eup %2793  ;;  %743 = vst [vmem:[%s3819_s27 + $0x38] sm:$0xff] %v735_v14  ;;  %v733_v58 = vmul.f32 %v2888_v56, %v2792_v57  ;;  %2819 = vpow2.f32 %v2380_v8  ;;  %v2897_v8 = vld [vmem:[%s3137_s11 + $0x90] sm:$0xff]  ;;  %v2900_v57 = vld [vmem:[%s3137_s11 + $0x88] sm:$0xff] }
 0x9c0   : > { %v2796_v34 = vpop.eup %2795  ;;  %740 = vst [vmem:[%s3819_s27 + $0x20] sm:$0xff] %v732_v11  ;;  %v1188_v37 = vadd.f32 1.0, %v2794_v55  ;;  %2821 = vpow2.f32 %v2377_v4  ;;  %v2901_v55 = vld [vmem:[%s3137_s11 + $0xb0] sm:$0xff] }
 0x9c1   : > { %v2798_v40 = vpop.eup %2797  ;;  %741 = vst [vmem:[%s3819_s27 + $0x28] sm:$0xff] %v733_v58  ;;  %v1189_v9 = vadd.f32 1.0, %v2796_v34  ;;  %2823 = vpow2.f32 %v2378_v42  ;;  %v2902_v34 = vld [vmem:[%s3137_s11 + $0xb8] sm:$0xff] }
 0x9c2   : > { %v2800_v59 = vpop.eup %2799  ;;  %v1210_v20 = vmul.f32 %v2889_v18, %v2798_v40  ;;  %2825 = vrcp.f32 %v1188_v37  ;;  %v2904_v18 = vld [vmem:[%s3137_s11 + $0xa8] sm:$0xff] }
 0x9c3   : > { %v2802_v26 = vpop.eup %2801  ;;  %v1211_v22 = vmul.f32 %v2890_v12, %v2800_v59  ;;  %2827 = vrcp.f32 %v1189_v9  ;;  %v2903_v9 = vld [vmem:[%s3137_s11 + $0xa0] sm:$0xff] }
 0x9c4   : > { %v2804_v49 = vpop.eup %2803  ;;  %2343 = vst [vmem:[%s3819_s27 + $0x50] sm:$0xff] %v1210_v20  ;;  %v1208_v29 = vmul.f32 %v2891_v23, %v2802_v26  ;;  %v2008_v26 = vpop.permute.xlu1 %2007 }
 0x9c5   : > { %v2806_v24 = vpop.eup %2805  ;;  %2344 = vst [vmem:[%s3819_s27 + $0x58] sm:$0xff] %v1211_v22  ;;  %v1209_v13 = vmul.f32 %v2892_v36, %v2804_v49 }
 0x9c6   : > { %v2808_v28 = vpop.eup %2807  ;;  %2341 = vst [vmem:[%s3819_s27 + $0x40] sm:$0xff] %v1208_v29  ;;  %v1214_v62 = vmul.f32 %v2893_v2, %v2806_v24  ;;  %v2013_v24 = vpop.permute.xlu0 %2012 }
 0x9c7   : > { %v2810_v60 = vpop.eup %2809  ;;  %2342 = vst [vmem:[%s3819_s27 + $0x48] sm:$0xff] %v1209_v13  ;;  %v1215_v3 = vmul.f32 %v2894_v63, %v2808_v28 }
 0x9c8   : > { %v2812_v19 = vpop.eup %2811  ;;  %2347 = vst [vmem:[%s3819_s27 + $0x70] sm:$0xff] %v1214_v62  ;;  %v1667_v5 = vadd.f32 1.0, %v2810_v60 }
 0x9c9   : > { %v2814_v47 = vpop.eup %2813  ;;  %2348 = vst [vmem:[%s3819_s27 + $0x78] sm:$0xff] %v1215_v3  ;;  %v1668_v15 = vadd.f32 1.0, %v2812_v19  ;;  %v2018_v19 = vpop.permute.xlu1 %2017 }
 0x9ca   : > { %v2816_v32 = vpop.eup %2815  ;;  %2829 = vrcp.f32 %v1667_v5  ;;  %v1665_v1 = vadd.f32 1.0, %v2814_v47 }
 0x9cb   : > { %v2818_v44 = vpop.eup %2817  ;;  %2831 = vrcp.f32 %v1668_v15  ;;  %v1666_v27 = vadd.f32 1.0, %v2816_v32 }
 0x9cc   : > { %v2820_v38 = vpop.eup %2819  ;;  %2833 = vrcp.f32 %v1665_v1  ;;  %v1671_v61 = vadd.f32 1.0, %v2818_v44 }
 0x9cd   : > { %v2822_v50 = vpop.eup %2821  ;;  %2835 = vrcp.f32 %v1666_v27  ;;  %v1672_v33 = vadd.f32 1.0, %v2820_v38  ;;  %v2023_v38 = vpop.permute.xlu0 %2022 }
 0x9ce   : > { %v2824_v16 = vpop.eup %2823  ;;  %2837 = vrcp.f32 %v1671_v61  ;;  %v1669_v45 = vadd.f32 1.0, %v2822_v50 }
 0x9cf   : > { %v2826_v7 = vpop.eup %2825  ;;  %2839 = vrcp.f32 %v1672_v33  ;;  %v1670_v46 = vadd.f32 1.0, %v2824_v16 }
 0x9d0   : > { %v2828_v48 = vpop.eup %2827  ;;  %v1212_v52 = vmul.f32 %v2895_v43, %v2826_v7  ;;  %2841 = vrcp.f32 %v1669_v45 }
 0x9d1   : > { %v1213_v0 = vmul.f32 %v2896_v25, %v2828_v48  ;;  %2843 = vrcp.f32 %v1670_v46 }
 0x9d2   : > { %2345 = vst [vmem:[%s3819_s27 + $0x60] sm:$0xff] %v1212_v52 }
 0x9d3   : > { %2346 = vst [vmem:[%s3819_s27 + $0x68] sm:$0xff] %v1213_v0 }
 0x9d7   : > { %v2830_v10 = vpop.eup %2829 }
 0x9d8   : > { %v2832_v53 = vpop.eup %2831  ;;  %v1691_v54 = vmul.f32 %v2897_v8, %v2830_v10 }
 0x9d9   : > { %v2834_v30 = vpop.eup %2833  ;;  %v1692_v4 = vmul.f32 %v2898_v41, %v2832_v53 }
 0x9da   : > { %v2836_v39 = vpop.eup %2835  ;;  %2383 = vst [vmem:[%s3819_s27 + $0x90] sm:$0xff] %v1691_v54  ;;  %v1689_v14 = vmul.f32 %v2899_v35, %v2834_v30 }
 0x9db   : > { %v2838_v42 = vpop.eup %2837  ;;  %2384 = vst [vmem:[%s3819_s27 + $0x98] sm:$0xff] %v1692_v4  ;;  %v1690_v51 = vmul.f32 %v2900_v57, %v2836_v39 }
 0x9dc   : > { %v2840_v11 = vpop.eup %2839  ;;  %2381 = vst [vmem:[%s3819_s27 + $0x80] sm:$0xff] %v1689_v14  ;;  %v1695_v56 = vmul.f32 %v2901_v55, %v2838_v42 }
 0x9dd   : > { %v2842_v58 = vpop.eup %2841  ;;  %2382 = vst [vmem:[%s3819_s27 + $0x88] sm:$0xff] %v1690_v51  ;;  %v1696_v37 = vmul.f32 %v2902_v34, %v2840_v11  ;;  %v2905_v11 = vld [vmem:[%s3137_s11 + $0xc0] sm:$0xff] }
 0x9de   : > { %v2844_v40 = vpop.eup %2843  ;;  %2387 = vst [vmem:[%s3819_s27 + $0xb0] sm:$0xff] %v1695_v56  ;;  %v1693_v59 = vmul.f32 %v2903_v9, %v2842_v58  ;;  %v2906_v58 = vld [vmem:[%s3137_s11 + $0xc8] sm:$0xff] }
 0x9df   : > { %2388 = vst [vmem:[%s3819_s27 + $0xb8] sm:$0xff] %v1696_v37  ;;  %v1694_v20 = vmul.f32 %v2904_v18, %v2844_v40  ;;  %v2907_v40 = vld [vmem:[%s3137_s11 + $0xd0] sm:$0xff]  ;;  %v2908_v18 = vld [vmem:[%s3137_s11 + $0xd8] sm:$0xff] }
 0x9e0   : > { %2385 = vst [vmem:[%s3819_s27 + $0xa0] sm:$0xff] %v1693_v59 }
 0x9e1   : > { %2386 = vst [vmem:[%s3819_s27 + $0xa8] sm:$0xff] %v1694_v20 }
 0xa52   : > { %v2091_v12 = vpop.f32.mrf.mxu0 }
 0xa53   : > { %v2092_v22 = vadd.f32 %v2091_v12, %v2008_v26  ;;  %v2909_v12 = vld [vmem:[%s3137_s11 + $0xe0] sm:$0xff] }
 0xa54   : > { %v2093_v49 = vpop.f32.mrf.mxu0 }
 0xa55   : > { %v2114_v23 = vadd.f32 %v2092_v22, %v3762_v6  ;;  %v2094_v29 = vadd.f32 %v2093_v49, %v2008_v26 }
 0xa56   : > { %v2097_v36 = vpop.f32.mrf.mxu0 }
 0xa57   : > { %v2413_v13 = vmul.f32 -1.442695, %v2114_v23  ;;  %v2115_v28 = vadd.f32 %v2094_v29, %v3762_v6  ;;  %v2098_v2 = vadd.f32 %v2097_v36, %v2013_v24  ;;  %v2910_v23 = vld [vmem:[%s3137_s11 + $0xe8] sm:$0xff]  ;;  %v2911_v36 = vld [vmem:[%s3137_s11 + $0xf0] sm:$0xff] }
 0xa58   : > { %v2099_v62 = vpop.f32.mrf.mxu0 }
 0xa59   : > { %2845 = vpow2.f32 %v2413_v13  ;;  %v2414_v60 = vmul.f32 -1.442695, %v2115_v28  ;;  %v2116_v63 = vadd.f32 %v2098_v2, %v3753_v21  ;;  %v2100_v3 = vadd.f32 %v2099_v62, %v2013_v24  ;;  %v2912_v2 = vld [vmem:[%s3137_s11 + $0xf8] sm:$0xff] }
 0xa5a   : > { %v2103_v5 = vpop.f32.mrf.mxu0 }
 0xa5b   : > { %2847 = vpow2.f32 %v2414_v60  ;;  %v2415_v47 = vmul.f32 -1.442695, %v2116_v63  ;;  %v2117_v15 = vadd.f32 %v2100_v3, %v3753_v21  ;;  %v2104_v32 = vadd.f32 %v2103_v5, %v2018_v19 }
 0xa5c   : > { %v2105_v1 = vpop.f32.mrf.mxu0 }
 0xa5d   : > { %2849 = vpow2.f32 %v2415_v47  ;;  %v2416_v44 = vmul.f32 -1.442695, %v2117_v15  ;;  %v2118_v27 = vadd.f32 %v2104_v32, %v3776_v31  ;;  %v2106_v6 = vadd.f32 %v2105_v1, %v2018_v19 }
 0xa5e   : > { %v2109_v61 = vpop.f32.mrf.mxu0 }
 0xa5f   : > { %2851 = vpow2.f32 %v2416_v44  ;;  %v2417_v50 = vmul.f32 -1.442695, %v2118_v27  ;;  %v2119_v33 = vadd.f32 %v2106_v6, %v3776_v31  ;;  %v2110_v16 = vadd.f32 %v2109_v61, %v2023_v38 }
 0xa60   : > { %v2111_v45 = vpop.f32.mrf.mxu0 }
 0xa61   : > { %2853 = vpow2.f32 %v2417_v50  ;;  %v2418_v7 = vmul.f32 -1.442695, %v2119_v33  ;;  %v2120_v46 = vadd.f32 %v2110_v16, %v3770_v17  ;;  %v2112_v21 = vadd.f32 %v2111_v45, %v2023_v38 }
 0xa63   : > { %2855 = vpow2.f32 %v2418_v7  ;;  %v2419_v48 = vmul.f32 -1.442695, %v2120_v46  ;;  %v2121_v43 = vadd.f32 %v2112_v21, %v3770_v17 }
 0xa65   : > { %2857 = vpow2.f32 %v2419_v48  ;;  %v2420_v52 = vmul.f32 -1.442695, %v2121_v43 }
 0xa66   : > { %v2846_v25 = vpop.eup %2845 }
 0xa67   : > { %v2146_v0 = vadd.f32 1.0, %v2846_v25  ;;  %2859 = vpow2.f32 %v2420_v52 }
 0xa68   : > { %v2848_v10 = vpop.eup %2847 }
 0xa69   : > { %2861 = vrcp.f32 %v2146_v0  ;;  %v2147_v53 = vadd.f32 1.0, %v2848_v10 }
 0xa6a   : > { %v2850_v31 = vpop.eup %2849 }
 0xa6b   : > { %2863 = vrcp.f32 %v2147_v53  ;;  %v2148_v8 = vadd.f32 1.0, %v2850_v31 }
 0xa6c   : > { %v2852_v54 = vpop.eup %2851 }
 0xa6d   : > { %2865 = vrcp.f32 %v2148_v8  ;;  %v2149_v30 = vadd.f32 1.0, %v2852_v54 }
 0xa6e   : > { %v2854_v41 = vpop.eup %2853 }
 0xa6f   : > { %2867 = vrcp.f32 %v2149_v30  ;;  %v2150_v4 = vadd.f32 1.0, %v2854_v41 }
 0xa70   : > { %v2856_v17 = vpop.eup %2855 }
 0xa71   : > { %2869 = vrcp.f32 %v2150_v4  ;;  %v2151_v39 = vadd.f32 1.0, %v2856_v17 }
 0xa72   : > { %v2858_v35 = vpop.eup %2857 }
 0xa73   : > { %2871 = vrcp.f32 %v2151_v39  ;;  %v2152_v14 = vadd.f32 1.0, %v2858_v35 }
 0xa74   : > { %v2860_v42 = vpop.eup %2859 }
 0xa75   : > { %2873 = vrcp.f32 %v2152_v14  ;;  %v2153_v57 = vadd.f32 1.0, %v2860_v42 }
 0xa76   : > { %v2862_v51 = vpop.eup %2861 }
 0xa77   : > { %v2170_v55 = vmul.f32 %v2905_v11, %v2862_v51  ;;  %2875 = vrcp.f32 %v2153_v57 }
 0xa78   : > { %v2864_v56 = vpop.eup %2863 }
 0xa79   : > { %2421 = vst [vmem:[%s3819_s27 + $0xc0] sm:$0xff] %v2170_v55  ;;  %v2171_v34 = vmul.f32 %v2906_v58, %v2864_v56 }
 0xa7a   : > { %v2866_v37 = vpop.eup %2865 }
 0xa7b   : > { %2422 = vst [vmem:[%s3819_s27 + $0xc8] sm:$0xff] %v2171_v34  ;;  %v2172_v9 = vmul.f32 %v2907_v40, %v2866_v37 }
 0xa7c   : > { %v2868_v59 = vpop.eup %2867 }
 0xa7d   : > { %2423 = vst [vmem:[%s3819_s27 + $0xd0] sm:$0xff] %v2172_v9  ;;  %v2173_v20 = vmul.f32 %v2908_v18, %v2868_v59 }
 0xa7e   : > { %v2870_v26 = vpop.eup %2869 }
 0xa7f   : > { %2424 = vst [vmem:[%s3819_s27 + $0xd8] sm:$0xff] %v2173_v20  ;;  %v2174_v22 = vmul.f32 %v2909_v12, %v2870_v26 }
 0xa80   : > { %v2872_v49 = vpop.eup %2871 }
 0xa81   : > { %2425 = vst [vmem:[%s3819_s27 + $0xe0] sm:$0xff] %v2174_v22  ;;  %v2175_v29 = vmul.f32 %v2910_v23, %v2872_v49 }
 0xa82   : > { %v2874_v24 = vpop.eup %2873 }
 0xa83   : > { %2426 = vst [vmem:[%s3819_s27 + $0xe8] sm:$0xff] %v2175_v29  ;;  %v2176_v13 = vmul.f32 %v2911_v36, %v2874_v24 }
 0xa84   : > { %v2876_v28 = vpop.eup %2875 }
 0xa85   : > { %2427 = vst [vmem:[%s3819_s27 + $0xf0] sm:$0xff] %v2176_v13  ;;  %v2177_v62 = vmul.f32 %v2912_v2, %v2876_v28 }
 0xa87   : > { %2428 = vst [vmem:[%s3819_s27 + $0xf8] sm:$0xff] %v2177_v62 }
 0xa88   : > { %2954 = shalt.err (!%p2951_p9)
}
 0xa89   : > { %s2955_s11 = scalar_lea.hbm %s3893_s10, 4096  ;;  %s2959_s19 = scalar_lea.hbm %s3943_s3, 16384 }
 0xa8a   : > { %p2956_p13 = scmp.ne.s32.totalorder %s3893_s10, %s2955_s11  ;;  %p2960_p2 = scmp.lt.s32.totalorder %s3893_s10, %s3943_s3 }
 0xa8b   : > { %p2961_p3 = scmp.lt.s32.totalorder %s2959_s19, %s2955_s11 }
 0xa8c   : > { %p2957_p1 = pnand %p2956_p13, %p3952_p11 }
 0xa8d   : > { %p2962_p6 = por %p2961_p3, %p2960_p2 }
 0xa8e   : > { %p2958_p0 = pneg %p2957_p1 }
 0xa90   : > { %p2963_p10 = pnand %p2962_p6, %p2958_p0 }
 0xa92   : > { %2966 = shalt.err (!%p2963_p10)
}
 0xa93   : > { %s3013_s26 = smov 256   ;;  %s3014_s27 = smov 16  }
 0xa94   : > { %2665 = dma.vmem_to_hbm [thread:$0]  (%p3952_p11), %s3895_s28, 4096, %s3893_s10, %s2188_s16, %s3013_s26, %s3013_s26, %s3014_s27  }
 0xa95 PF: > { %p2676_p12 = scmp.ge.s32.totalorder %s3005_s15, 2  ;;  %s2217_s9 = sand.u32 1, %s2993_s12  }
 0xa96   : > { %p3953_p4 = scmp.ne.s32.totalorder %s3949_s25, 0  ;;  %s2218_s29 = scalar_lea.sflag [#allocation4], %s2217_s9 }
 0xa98   : > { %p2672_p5 = pnand %p2676_p12, %p3953_p4 }
 0xa9a   : > { %p2673_p7 = pneg %p2672_p5 }
 0xa9c   : > { %2988 = dma.done.wait (%p2673_p7), %s2218_s29, 4096  }
 0xa9d   : > { %2990 = vsyncadd (%p2673_p7), %s2218_s29, 4294963200  ;;  %p16_p8 = scmp.ge.s32.totalorder %s3060_s18, 6   ;;  %s3954_s12 = smov %s2997_s13 }
 0xa9e   : > { %s3955_s13 = smov %s3001_s14  ;;  %s3956_s14 = smov %s3072_s21 }
 0xa9f   : > { %s3957_s15 = smov %s3060_s18  ;;  %18 = sbr.rel (!%p16_p8) target bundleno = 5 (0x5), region = 83 }
 0xaa4   :  { %2223 = vsyncpa [#allocation3], 1 }
 0xaa5   :  { %2225 = vsyncpa [#allocation3 + $0x1], 1 }
 0xaa6   :  { %2226 = vsyncpa [#allocation4], 1 }
 0xaa7   :  { %2228 = vsyncpa [#allocation4 + $0x1], 1 }

</bundles_post_ra>
